<compile_context>
chip_gen: v7x
topology: tpu7x:2x2x1
jax: 0.10.0
libtpu: 0.0.40
codegen_flags: <defaults>
</compile_context>

<pallas_src>
import jax
import jax.numpy as jnp
from jax import lax
from jax.experimental import pallas as pl
from jax.experimental.pallas import tpu as pltpu

ETA = 1e-5        # Constants.eta in the pvae / hvae codebase
CURV = 1.0        # Poincare ball curvature c (manifold.c)
MIN_NORM = 1e-15  # clamp used by expmap0 to avoid division by zero


def _round_up(x, m):
    return ((x + m - 1) // m) * m


def _vmem_capacity_bytes():
    try:
        return int(pltpu.get_tpu_info().vmem_capacity_bytes)
    except Exception:
        return 64 << 20   # conservative (v7x-sized) default


def _pad2d(a, rows, cols):
    """Zero-pad a 2-D array up to (rows, cols)."""
    r, c = a.shape
    if r == rows and c == cols:
        return a
    out = jnp.zeros((rows, cols), a.dtype)
    return out.at[:r, :c].set(a)


def _make_kernel(num_hidden_layers, coord_dim):
    """Kernel body for a fixed number of hidden layers.

    refs = [x, (w, b) * num_hidden_layers, w_head, b_head, out]
      x       : [TB, d_in]              native dtype (cast to bf16 on VPU)
      w       : bf16 [in, hidden_pad]   resident, zero-padded lane-dense
      b       : f32  [1, hidden_pad]    resident, zero-padded
      w_head  : bf16 [hidden_pad, OUT_PAD]  (fc21 | fc22 | zero padding)
      b_head  : f32  [1, OUT_PAD]
      out     : f32  [TB, OUT_PAD]      lane-dense packed (mu | sigma | pad)
    """

    def kernel(*refs):
        x_ref = refs[0]
        idx = 1

        h = x_ref[...].astype(jnp.bfloat16)
        for _ in range(num_hidden_layers):
            w = refs[idx][...]
            b = refs[idx + 1][...]
            idx += 2
            h = jnp.dot(h, w, preferred_element_type=jnp.float32) + b
            h = jnp.maximum(h, 0.0).astype(jnp.bfloat16)  # non_lin = ReLU

        w_head = refs[idx][...]
        b_head = refs[idx + 1][...]
        out_ref = refs[idx + 2]

        # One fused skinny matmul for fc21 | fc22 (lane-dense, 128-padded).
        z = jnp.dot(h, w_head, preferred_element_type=jnp.float32) + b_head

        lane = lax.broadcasted_iota(jnp.int32, z.shape, 1)
        mu_mask = lane < coord_dim

        # fc21 -> expmap0 on the Poincare ball:
        #   expmap0(u) = tanh(sqrt(c) * ||u||) * u / (sqrt(c) * ||u||)
        mu_e = jnp.where(mu_mask, z, 0.0)
        sqrt_c = jnp.sqrt(jnp.float32(CURV))
        norm = jnp.sqrt(jnp.sum(mu_e * mu_e, axis=-1, keepdims=True))
        norm = jnp.maximum(norm, MIN_NORM)
        scn = sqrt_c * norm
        # approx reciprocal on a [TB,1] column lives entirely in the EUP slot
        gamma = jnp.tanh(scn) * pl.reciprocal(scn, approx=True)

        # fc22 -> softplus + eta  (branch-free softplus: 2 EUP ops)
        sp = jnp.maximum(z, 0.0) + jnp.log1p(jnp.exp(-jnp.abs(z)))

        out_ref[...] = jnp.where(mu_mask, gamma * z, sp + ETA).astype(out_ref.dtype)

    return kernel


def _pick_batch_tile(b_total, d_in, x_itemsize, out_pad, hidden_pad,
                     vmem_cap, resident_bytes):
    """Pick the batch tile from a generation-aware VMEM budget."""
    # Measured mem-bound roofline: >=512-row tiles reach >=85%. 64-MiB chips
    # (v7x per-TC) get an ~8 MiB per-row budget, 128-MiB chips (v5e/v6e) ~20 MiB.
    if vmem_cap <= (64 << 20):
        budget = 8 << 20
    else:
        budget = 20 << 20
    # Leave room for resident weights (worst case double-buffered) + headroom.
    avail = vmem_cap - 2 * resident_bytes - (16 << 20)
    budget = min(budget, max(avail, 2 << 20))

    per_row = (2 * d_in * x_itemsize      # double-buffered x tile
               + 2 * out_pad * 4          # double-buffered f32 output tile
               + 6 * hidden_pad * 4)      # activation / relayout slack
    tb = max(8, min(2048, (budget // per_row) // 8 * 8))

    if b_total >= 16:
        # keep >= 2 grid steps so dimension_semantics=("parallel",) can shard
        # the batch across v7x's two TensorCores
        tb = min(tb, _round_up((b_total + 1) // 2, 8))
    tb = min(tb, _round_up(b_total, 8))
    return int(tb)


def enc_wrapped_forward(x, params, data_size):
    """Run the EncWrapped forward pass.

    x:       [..., *data_size]  (e.g. NCHW image), any float dtype
             (a bf16 producer can pass bf16 directly: the kernel casts in VMEM)
    params:  dict with 'hidden' = [(w, b), ...], 'w21', 'b21', 'w22', 'b22'
             (weights stored [in_features, out_features], f32)
    returns: (mu, sigma)
    """
    batch_dims = x.shape[: x.ndim - len(data_size)]
    d_in = 1
    for s in data_size:
        d_in *= s
    b_total = 1
    for s in batch_dims:
        b_total *= s
    x2d = x.reshape(b_total, d_in)          # no dtype cast, no batch padding

    hidden = params["hidden"]
    num_hidden_layers = len(hidden)
    hidden_dim = hidden[-1][0].shape[1]
    hidden_pad = _round_up(hidden_dim, 128)  # lane-dense activations

    w21, b21 = params["w21"], params["b21"]
    w22, b22 = params["w22"], params["b22"]
    coord_dim = w21.shape[1]
    sig_dim = w22.shape[1]
    head_dim = coord_dim + sig_dim
    out_pad = _round_up(head_dim, 128)       # lane-dense output slab

    # ---- resident weights: bf16 (MXU), zero-padded to lane-dense shapes ----
    resident = []
    in_rows = d_in
    for (w, b) in hidden:
        w_p = _pad2d(w.astype(jnp.float32), in_rows, hidden_pad).astype(jnp.bfloat16)
        b_p = _pad2d(b.astype(jnp.float32).reshape(1, -1), 1, hidden_pad)
        resident += [w_p, b_p]
        in_rows = hidden_pad

    # Fuse fc21 | fc22 into one padded head matrix.
    w_head = jnp.zeros((hidden_pad, out_pad), jnp.float32)
    w_head = w_head.at[:hidden_dim, :coord_dim].set(w21.astype(jnp.float32))
    w_head = w_head.at[:hidden_dim, coord_dim:head_dim].set(w22.astype(jnp.float32))
    b_head = jnp.zeros((1, out_pad), jnp.float32)
    b_head = b_head.at[0, :coord_dim].set(b21.astype(jnp.float32))
    b_head = b_head.at[0, coord_dim:head_dim].set(b22.astype(jnp.float32))
    resident += [w_head.astype(jnp.bfloat16), b_head]

    resident_bytes = sum(int(a.size) * a.dtype.itemsize for a in resident)

    vmem_cap = _vmem_capacity_bytes()
    tb = _pick_batch_tile(b_total, d_in, x2d.dtype.itemsize, out_pad,
                          hidden_pad, vmem_cap, resident_bytes)
    # Ragged last tile: rows are independent, OOB output rows are masked.
    grid = (pl.cdiv(b_total, tb),)

    kernel = _make_kernel(num_hidden_layers, coord_dim)
    inputs = [x2d] + resident

    # Generation-aware VMEM budget (no hard 32 MiB clamp).
    vmem_need = (2 * tb * d_in * x2d.dtype.itemsize
                 + 2 * tb * out_pad * 4
                 + 6 * tb * hidden_pad * 4
                 + 2 * resident_bytes
                 + (4 << 20))
    vmem_limit = int(min(max(vmem_need, 16 << 20),
                         max(vmem_cap - (8 << 20), 16 << 20)))

    flops = 2 * b_total * (d_in * hidden_pad
                           + (num_hidden_layers - 1) * hidden_pad * hidden_pad
                           + hidden_pad * out_pad)
    bytes_accessed = (x2d.size * x2d.dtype.itemsize
                      + resident_bytes
                      + b_total * out_pad * 4)
    transcendentals = b_total * (2 * out_pad + 2)

    def _run(single_buffer_weights):
        in_specs = [pl.BlockSpec((tb, d_in), lambda i: (i, 0))]
        for arr in resident:
            if single_buffer_weights:
                # weights never change across the grid: single-buffer them
                spec = pl.BlockSpec(arr.shape, lambda i: (0, 0),
                                    pipeline_mode=pl.Buffered(1))
            else:
                spec = pl.BlockSpec(arr.shape, lambda i: (0, 0))
            in_specs.append(spec)

        out = pl.pallas_call(
            kernel,
            grid=grid,
            in_specs=in_specs,
            out_specs=pl.BlockSpec((tb, out_pad), lambda i: (i, 0)),
            out_shape=jax.ShapeDtypeStruct((b_total, out_pad), jnp.float32),
            compiler_params=pltpu.CompilerParams(
                dimension_semantics=("parallel",),
                vmem_limit_bytes=vmem_limit,
            ),
            cost_estimate=pl.CostEstimate(
                flops=int(flops),
                transcendentals=int(transcendentals),
                bytes_accessed=int(bytes_accessed),
            ),
        )(*inputs)
        return jax.block_until_ready(out)

    try:
        out = _run(True)
    except Exception:
        # pl.Buffered(1) not supported on this jax/libtpu build — fall back to
        # default double-buffered resident weights (correctness unchanged).
        out = _run(False)

    packed = out[:, :head_dim]               # single readback slice of the slab
    mu = packed[:, :coord_dim].reshape(batch_dims + (coord_dim,))
    sigma = packed[:, coord_dim:].reshape(batch_dims + (sig_dim,))
    return mu, sigma


def _init_linear(key, fan_in, fan_out):
    # deterministic init mimicking nn.Linear's U(-1/sqrt(fan_in), 1/sqrt(fan_in))
    kw, kb = jax.random.split(key)
    bound = 1.0 / jnp.sqrt(jnp.float32(fan_in))
    w = jax.random.uniform(kw, (fan_in, fan_out), jnp.float32, -bound, bound)
    b = jax.random.uniform(kb, (fan_out,), jnp.float32, -bound, bound)
    return w, b


def _reference_forward(x, params, data_size):
    """Pure-JAX reference mirroring the kernel's bf16-matmul / f32-accumulate."""
    batch_dims = x.shape[: x.ndim - len(data_size)]
    h = x.reshape(batch_dims + (-1,)).astype(jnp.bfloat16)
    for (w, b) in params["hidden"]:
        h = jnp.dot(h, w.astype(jnp.bfloat16),
                    preferred_element_type=jnp.float32) + b
        h = jnp.maximum(h, 0.0).astype(jnp.bfloat16)
    mu_e = jnp.dot(h, params["w21"].astype(jnp.bfloat16),
                   preferred_element_type=jnp.float32) + params["b21"]
    s_in = jnp.dot(h, params["w22"].astype(jnp.bfloat16),
                   preferred_element_type=jnp.float32) + params["b22"]
    norm = jnp.maximum(
        jnp.sqrt(jnp.sum(mu_e * mu_e, axis=-1, keepdims=True)), MIN_NORM)
    sqrt_c = jnp.sqrt(jnp.float32(CURV))
    mu = jnp.tanh(sqrt_c * norm) / (sqrt_c * norm) * mu_e
    sigma = jax.nn.softplus(s_in) + ETA
    return mu, sigma


if __name__ == "__main__":
    key = jax.random.PRNGKey(0)

    # module hyper-parameters (small, consistent with the PyTorch __init__)
    data_size = (4, 16, 16)          # small NCHW image per sample
    batch = 2
    hidden_dim = 32
    num_hidden_layers = 2            # first layer + 1 extra hidden layer
    coord_dim = 6                    # manifold.coord_dim
    prior_iso = False                # fc22 output dim = coord_dim

    d_in = 4 * 16 * 16

    keys = jax.random.split(key, num_hidden_layers + 3)
    hidden_params = []
    fan_in = d_in
    for l in range(num_hidden_layers):
        w, b = _init_linear(keys[l], fan_in, hidden_dim)
        hidden_params.append((w, b))
        fan_in = hidden_dim
    w21, b21 = _init_linear(keys[num_hidden_layers], hidden_dim, coord_dim)
    sig_dim = coord_dim if not prior_iso else 1
    w22, b22 = _init_linear(keys[num_hidden_layers + 1], hidden_dim, sig_dim)

    params = {"hidden": hidden_params, "w21": w21, "b21": b21,
              "w22": w22, "b22": b22}

    x = jax.random.normal(keys[-1], (batch,) + data_size, jnp.float32)

    mu, sigma = enc_wrapped_forward(x, params, data_size)
    jax.block_until_ready((mu, sigma))

    mu_ref, sigma_ref = _reference_forward(x, params, data_size)
    assert mu.shape == (batch, coord_dim) and sigma.shape == (batch, sig_dim)
    # tolerance covers bf16 MXU inputs + approx EUP reciprocal in expmap0
    assert jnp.allclose(mu, mu_ref, atol=2e-3, rtol=2e-3)
    assert jnp.allclose(sigma, sigma_ref, atol=2e-3, rtol=2e-3)
    assert bool(jnp.all(sigma > 0.0))
    assert bool(jnp.all(jnp.sum(mu * mu, axis=-1) < 1.0))  # inside Poincare ball

    # TODO(synk): the PyTorch module also returns `self.manifold` (a Python
    # object); only the (mu, sigma) tensor outputs are produced by the kernel.
    print("KERNEL_OK")
</pallas_src>

<mosaic_0001>
module attributes {stable_mosaic.version = 11 : i64} {
  func.func @kernel(%arg0: i32, %arg1: memref<8x1024xf32, #tpu.memory_space<vmem>>, %arg2: memref<1024x128xbf16, #tpu.memory_space<vmem>>, %arg3: memref<1x128xf32, #tpu.memory_space<vmem>>, %arg4: memref<128x128xbf16, #tpu.memory_space<vmem>>, %arg5: memref<1x128xf32, #tpu.memory_space<vmem>>, %arg6: memref<128x128xbf16, #tpu.memory_space<vmem>>, %arg7: memref<1x128xf32, #tpu.memory_space<vmem>>, %arg8: memref<8x128xf32, #tpu.memory_space<vmem>>) attributes {dimension_semantics = [#tpu.dimension_semantics<parallel>], iteration_bounds = array<i64: 1>, scalar_prefetch = 0 : i64, scratch_operands = 0 : i64, tpu.core_type = #tpu.core_type<tc>, window_params = [{transform_indices = @transform_0, window_bounds = array<i64: 8, 1024>}, {pipeline_mode = #tpu.pipeline_mode<synchronous>, transform_indices = @transform_1, window_bounds = array<i64: 1024, 128>}, {pipeline_mode = #tpu.pipeline_mode<synchronous>, transform_indices = @transform_2, window_bounds = array<i64: 1, 128>}, {pipeline_mode = #tpu.pipeline_mode<synchronous>, transform_indices = @transform_3, window_bounds = array<i64: 128, 128>}, {pipeline_mode = #tpu.pipeline_mode<synchronous>, transform_indices = @transform_4, window_bounds = array<i64: 1, 128>}, {pipeline_mode = #tpu.pipeline_mode<synchronous>, transform_indices = @transform_5, window_bounds = array<i64: 128, 128>}, {pipeline_mode = #tpu.pipeline_mode<synchronous>, transform_indices = @transform_6, window_bounds = array<i64: 1, 128>}, {transform_indices = @transform_7, window_bounds = array<i64: 8, 128>}]} {
    %c0 = arith.constant 0 : index
    %c0_0 = arith.constant 0 : index
    %0 = vector.load %arg1[%c0, %c0_0] : memref<8x1024xf32, #tpu.memory_space<vmem>>, vector<8x1024xf32>
    %1 = arith.truncf %0 : vector<8x1024xf32> to vector<8x1024xbf16>
    %c0_1 = arith.constant 0 : index
    %c0_2 = arith.constant 0 : index
    %2 = vector.load %arg2[%c0_1, %c0_2] : memref<1024x128xbf16, #tpu.memory_space<vmem>>, vector<1024x128xbf16>
    %c0_3 = arith.constant 0 : index
    %c0_4 = arith.constant 0 : index
    %3 = vector.load %arg3[%c0_3, %c0_4] : memref<1x128xf32, #tpu.memory_space<vmem>>, vector<1x128xf32>
    %cst = arith.constant dense<0.000000e+00> : vector<8x128xf32>
    %4 = tpu.matmul %1, %2, %cst {dimension_numbers = #tpu.dot_dimension_numbers<[1], [0], [0], [1], [0, 0, 1, 1], [], []>} : vector<8x1024xbf16>, vector<1024x128xbf16>, vector<8x128xf32> -> vector<8x128xf32>
    %5 = vector.broadcast %3 : vector<1x128xf32> to vector<8x128xf32>
    %6 = arith.addf %4, %5 : vector<8x128xf32>
    %cst_5 = arith.constant 0.000000e+00 : f32
    %7 = vector.broadcast %cst_5 : f32 to vector<8x128xf32>
    %8 = arith.maximumf %6, %7 : vector<8x128xf32>
    %9 = arith.truncf %8 : vector<8x128xf32> to vector<8x128xbf16>
    %c0_6 = arith.constant 0 : index
    %c0_7 = arith.constant 0 : index
    %10 = vector.load %arg4[%c0_6, %c0_7] : memref<128x128xbf16, #tpu.memory_space<vmem>>, vector<128x128xbf16>
    %c0_8 = arith.constant 0 : index
    %c0_9 = arith.constant 0 : index
    %11 = vector.load %arg5[%c0_8, %c0_9] : memref<1x128xf32, #tpu.memory_space<vmem>>, vector<1x128xf32>
    %cst_10 = arith.constant dense<0.000000e+00> : vector<8x128xf32>
    %12 = tpu.matmul %9, %10, %cst_10 {dimension_numbers = #tpu.dot_dimension_numbers<[1], [0], [0], [1], [0, 0, 1, 1], [], []>} : vector<8x128xbf16>, vector<128x128xbf16>, vector<8x128xf32> -> vector<8x128xf32>
    %13 = vector.broadcast %11 : vector<1x128xf32> to vector<8x128xf32>
    %14 = arith.addf %12, %13 : vector<8x128xf32>
    %cst_11 = arith.constant 0.000000e+00 : f32
    %15 = vector.broadcast %cst_11 : f32 to vector<8x128xf32>
    %16 = arith.maximumf %14, %15 : vector<8x128xf32>
    %17 = arith.truncf %16 : vector<8x128xf32> to vector<8x128xbf16>
    %c0_12 = arith.constant 0 : index
    %c0_13 = arith.constant 0 : index
    %18 = vector.load %arg6[%c0_12, %c0_13] : memref<128x128xbf16, #tpu.memory_space<vmem>>, vector<128x128xbf16>
    %c0_14 = arith.constant 0 : index
    %c0_15 = arith.constant 0 : index
    %19 = vector.load %arg7[%c0_14, %c0_15] : memref<1x128xf32, #tpu.memory_space<vmem>>, vector<1x128xf32>
    %cst_16 = arith.constant dense<0.000000e+00> : vector<8x128xf32>
    %20 = tpu.matmul %17, %18, %cst_16 {dimension_numbers = #tpu.dot_dimension_numbers<[1], [0], [0], [1], [0, 0, 1, 1], [], []>} : vector<8x128xbf16>, vector<128x128xbf16>, vector<8x128xf32> -> vector<8x128xf32>
    %21 = vector.broadcast %19 : vector<1x128xf32> to vector<8x128xf32>
    %22 = arith.addf %20, %21 : vector<8x128xf32>
    %23 = tpu.iota {dimensions = array<i32: 1>} : vector<8x128xi32>
    %c6_i32 = arith.constant 6 : i32
    %24 = vector.broadcast %c6_i32 : i32 to vector<8x128xi32>
    %25 = arith.cmpi slt, %23, %24 : vector<8x128xi32>
    %cst_17 = arith.constant 0.000000e+00 : f32
    %26 = vector.broadcast %cst_17 : f32 to vector<8x128xf32>
    %27 = arith.select %25, %22, %26 : vector<8x128xi1>, vector<8x128xf32>
    %cst_18 = arith.constant 1.000000e+00 : f32
    %28 = math.sqrt %cst_18 : f32
    %29 = arith.mulf %27, %27 : vector<8x128xf32>
    %cst_19 = arith.constant dense<0.000000e+00> : vector<8xf32>
    %30 = vector.multi_reduction <add>, %29, %cst_19 [1] : vector<8x128xf32> to vector<8xf32>
    %31 = vector.shape_cast %30 : vector<8xf32> to vector<8x1xf32>
    %32 = math.sqrt %31 : vector<8x1xf32>
    %cst_20 = arith.constant 1.000000e-15 : f32
    %33 = vector.broadcast %cst_20 : f32 to vector<8x1xf32>
    %34 = arith.maximumf %32, %33 : vector<8x1xf32>
    %35 = vector.broadcast %28 : f32 to vector<8x1xf32>
    %36 = arith.mulf %35, %34 : vector<8x1xf32>
    %37 = math.tanh %36 : vector<8x1xf32>
    %38 = tpu.reciprocal %36 {approx = true} : vector<8x1xf32> -> vector<8x1xf32>
    %39 = arith.mulf %37, %38 : vector<8x1xf32>
    %cst_21 = arith.constant 0.000000e+00 : f32
    %40 = vector.broadcast %cst_21 : f32 to vector<8x128xf32>
    %41 = arith.maximumf %22, %40 : vector<8x128xf32>
    %42 = math.absf %22 : vector<8x128xf32>
    %cst_22 = arith.constant 0.000000e+00 : f32
    %43 = vector.broadcast %cst_22 : f32 to vector<8x128xf32>
    %44 = arith.subf %43, %42 : vector<8x128xf32>
    %45 = math.exp %44 : vector<8x128xf32>
    %46 = math.log1p %45 : vector<8x128xf32>
    %47 = arith.addf %41, %46 : vector<8x128xf32>
    %48 = vector.broadcast %39 : vector<8x1xf32> to vector<8x128xf32>
    %49 = arith.mulf %48, %22 : vector<8x128xf32>
    %cst_23 = arith.constant 9.99999974E-6 : f32
    %50 = vector.broadcast %cst_23 : f32 to vector<8x128xf32>
    %51 = arith.addf %47, %50 : vector<8x128xf32>
    %52 = arith.select %25, %49, %51 : vector<8x128xi1>, vector<8x128xf32>
    %c0_24 = arith.constant 0 : index
    %c0_25 = arith.constant 0 : index
    %53 = vector.load %arg8[%c0_24, %c0_25] : memref<8x128xf32, #tpu.memory_space<vmem>>, vector<8x128xf32>
    tpu.vector_store %arg8[%c0_24, %c0_25], %52 {strides = array<i32>} : memref<8x128xf32, #tpu.memory_space<vmem>>, vector<8x128xf32>,
    return
  }
  func.func @transform_0(%arg0: i32) -> (i32, i32) {
    %c0_i32 = arith.constant 0 : i32
    %c0_i32_0 = arith.constant 0 : i32
    return %arg0, %c0_i32 : i32, i32
  }
  func.func @transform_1(%arg0: i32) -> (i32, i32) {
    %c0_i32 = arith.constant 0 : i32
    %c0_i32_0 = arith.constant 0 : i32
    %c0_i32_1 = arith.constant 0 : i32
    return %c0_i32, %c0_i32_0 : i32, i32
  }
  func.func @transform_2(%arg0: i32) -> (i32, i32) {
    %c0_i32 = arith.constant 0 : i32
    %c0_i32_0 = arith.constant 0 : i32
    %c0_i32_1 = arith.constant 0 : i32
    return %c0_i32, %c0_i32_0 : i32, i32
  }
  func.func @transform_3(%arg0: i32) -> (i32, i32) {
    %c0_i32 = arith.constant 0 : i32
    %c0_i32_0 = arith.constant 0 : i32
    %c0_i32_1 = arith.constant 0 : i32
    return %c0_i32, %c0_i32_0 : i32, i32
  }
  func.func @transform_4(%arg0: i32) -> (i32, i32) {
    %c0_i32 = arith.constant 0 : i32
    %c0_i32_0 = arith.constant 0 : i32
    %c0_i32_1 = arith.constant 0 : i32
    return %c0_i32, %c0_i32_0 : i32, i32
  }
  func.func @transform_5(%arg0: i32) -> (i32, i32) {
    %c0_i32 = arith.constant 0 : i32
    %c0_i32_0 = arith.constant 0 : i32
    %c0_i32_1 = arith.constant 0 : i32
    return %c0_i32, %c0_i32_0 : i32, i32
  }
  func.func @transform_6(%arg0: i32) -> (i32, i32) {
    %c0_i32 = arith.constant 0 : i32
    %c0_i32_0 = arith.constant 0 : i32
    %c0_i32_1 = arith.constant 0 : i32
    return %c0_i32, %c0_i32_0 : i32, i32
  }
  func.func @transform_7(%arg0: i32) -> (i32, i32) {
    %c0_i32 = arith.constant 0 : i32
    %c0_i32_0 = arith.constant 0 : i32
    return %arg0, %c0_i32 : i32, i32
  }
}

module attributes {stable_mosaic.version = 11 : i64} {
  func.func @kernel(%arg0: i32, %arg1: memref<8x1024xf32, #tpu.memory_space<vmem>>, %arg2: memref<1024x128xbf16, #tpu.memory_space<vmem>>, %arg3: memref<1x128xf32, #tpu.memory_space<vmem>>, %arg4: memref<128x128xbf16, #tpu.memory_space<vmem>>, %arg5: memref<1x128xf32, #tpu.memory_space<vmem>>, %arg6: memref<128x128xbf16, #tpu.memory_space<vmem>>, %arg7: memref<1x128xf32, #tpu.memory_space<vmem>>, %arg8: memref<8x128xf32, #tpu.memory_space<vmem>>) attributes {dimension_semantics = [#tpu.dimension_semantics<parallel>], iteration_bounds = array<i64: 1>, scalar_prefetch = 0 : i64, scratch_operands = 0 : i64, tpu.core_type = #tpu.core_type<tc>, window_params = [{transform_indices = @transform_0, window_bounds = array<i64: 8, 1024>}, {pipeline_mode = #tpu.pipeline_mode<synchronous>, transform_indices = @transform_1, window_bounds = array<i64: 1024, 128>}, {pipeline_mode = #tpu.pipeline_mode<synchronous>, transform_indices = @transform_2, window_bounds = array<i64: 1, 128>}, {pipeline_mode = #tpu.pipeline_mode<synchronous>, transform_indices = @transform_3, window_bounds = array<i64: 128, 128>}, {pipeline_mode = #tpu.pipeline_mode<synchronous>, transform_indices = @transform_4, window_bounds = array<i64: 1, 128>}, {pipeline_mode = #tpu.pipeline_mode<synchronous>, transform_indices = @transform_5, window_bounds = array<i64: 128, 128>}, {pipeline_mode = #tpu.pipeline_mode<synchronous>, transform_indices = @transform_6, window_bounds = array<i64: 1, 128>}, {transform_indices = @transform_7, window_bounds = array<i64: 8, 128>}]} {
    %c0 = arith.constant 0 : index
    %c0_0 = arith.constant 0 : index
    %0 = vector.load %arg1[%c0, %c0_0] : memref<8x1024xf32, #tpu.memory_space<vmem>>, vector<8x1024xf32>
    %1 = arith.truncf %0 : vector<8x1024xf32> to vector<8x1024xbf16>
    %c0_1 = arith.constant 0 : index
    %c0_2 = arith.constant 0 : index
    %2 = vector.load %arg2[%c0_1, %c0_2] : memref<1024x128xbf16, #tpu.memory_space<vmem>>, vector<1024x128xbf16>
    %c0_3 = arith.constant 0 : index
    %c0_4 = arith.constant 0 : index
    %3 = vector.load %arg3[%c0_3, %c0_4] : memref<1x128xf32, #tpu.memory_space<vmem>>, vector<1x128xf32>
    %cst = arith.constant dense<0.000000e+00> : vector<8x128xf32>
    %4 = tpu.matmul %1, %2, %cst {dimension_numbers = #tpu.dot_dimension_numbers<[1], [0], [0], [1], [0, 0, 1, 1], [], []>} : vector<8x1024xbf16>, vector<1024x128xbf16>, vector<8x128xf32> -> vector<8x128xf32>
    %5 = vector.broadcast %3 : vector<1x128xf32> to vector<8x128xf32>
    %6 = arith.addf %4, %5 : vector<8x128xf32>
    %cst_5 = arith.constant 0.000000e+00 : f32
    %7 = vector.broadcast %cst_5 : f32 to vector<8x128xf32>
    %8 = arith.maximumf %6, %7 : vector<8x128xf32>
    %9 = arith.truncf %8 : vector<8x128xf32> to vector<8x128xbf16>
    %c0_6 = arith.constant 0 : index
    %c0_7 = arith.constant 0 : index
    %10 = vector.load %arg4[%c0_6, %c0_7] : memref<128x128xbf16, #tpu.memory_space<vmem>>, vector<128x128xbf16>
    %c0_8 = arith.constant 0 : index
    %c0_9 = arith.constant 0 : index
    %11 = vector.load %arg5[%c0_8, %c0_9] : memref<1x128xf32, #tpu.memory_space<vmem>>, vector<1x128xf32>
    %cst_10 = arith.constant dense<0.000000e+00> : vector<8x128xf32>
    %12 = tpu.matmul %9, %10, %cst_10 {dimension_numbers = #tpu.dot_dimension_numbers<[1], [0], [0], [1], [0, 0, 1, 1], [], []>} : vector<8x128xbf16>, vector<128x128xbf16>, vector<8x128xf32> -> vector<8x128xf32>
    %13 = vector.broadcast %11 : vector<1x128xf32> to vector<8x128xf32>
    %14 = arith.addf %12, %13 : vector<8x128xf32>
    %cst_11 = arith.constant 0.000000e+00 : f32
    %15 = vector.broadcast %cst_11 : f32 to vector<8x128xf32>
    %16 = arith.maximumf %14, %15 : vector<8x128xf32>
    %17 = arith.truncf %16 : vector<8x128xf32> to vector<8x128xbf16>
    %c0_12 = arith.constant 0 : index
    %c0_13 = arith.constant 0 : index
    %18 = vector.load %arg6[%c0_12, %c0_13] : memref<128x128xbf16, #tpu.memory_space<vmem>>, vector<128x128xbf16>
    %c0_14 = arith.constant 0 : index
    %c0_15 = arith.constant 0 : index
    %19 = vector.load %arg7[%c0_14, %c0_15] : memref<1x128xf32, #tpu.memory_space<vmem>>, vector<1x128xf32>
    %cst_16 = arith.constant dense<0.000000e+00> : vector<8x128xf32>
    %20 = tpu.matmul %17, %18, %cst_16 {dimension_numbers = #tpu.dot_dimension_numbers<[1], [0], [0], [1], [0, 0, 1, 1], [], []>} : vector<8x128xbf16>, vector<128x128xbf16>, vector<8x128xf32> -> vector<8x128xf32>
    %21 = vector.broadcast %19 : vector<1x128xf32> to vector<8x128xf32>
    %22 = arith.addf %20, %21 : vector<8x128xf32>
    %23 = tpu.iota {dimensions = array<i32: 1>} : vector<8x128xi32>
    %c6_i32 = arith.constant 6 : i32
    %24 = vector.broadcast %c6_i32 : i32 to vector<8x128xi32>
    %25 = arith.cmpi slt, %23, %24 : vector<8x128xi32>
    %cst_17 = arith.constant 0.000000e+00 : f32
    %26 = vector.broadcast %cst_17 : f32 to vector<8x128xf32>
    %27 = arith.select %25, %22, %26 : vector<8x128xi1>, vector<8x128xf32>
    %cst_18 = arith.constant 1.000000e+00 : f32
    %28 = math.sqrt %cst_18 : f32
    %29 = arith.mulf %27, %27 : vector<8x128xf32>
    %cst_19 = arith.constant dense<0.000000e+00> : vector<8xf32>
    %30 = vector.multi_reduction <add>, %29, %cst_19 [1] : vector<8x128xf32> to vector<8xf32>
    %31 = vector.shape_cast %30 : vector<8xf32> to vector<8x1xf32>
    %32 = math.sqrt %31 : vector<8x1xf32>
    %cst_20 = arith.constant 1.000000e-15 : f32
    %33 = vector.broadcast %cst_20 : f32 to vector<8x1xf32>
    %34 = arith.maximumf %32, %33 : vector<8x1xf32>
    %35 = vector.broadcast %28 : f32 to vector<8x1xf32>
    %36 = arith.mulf %35, %34 : vector<8x1xf32>
    %37 = math.tanh %36 : vector<8x1xf32>
    %38 = tpu.reciprocal %36 {approx = true} : vector<8x1xf32> -> vector<8x1xf32>
    %39 = arith.mulf %37, %38 : vector<8x1xf32>
    %cst_21 = arith.constant 0.000000e+00 : f32
    %40 = vector.broadcast %cst_21 : f32 to vector<8x128xf32>
    %41 = arith.maximumf %22, %40 : vector<8x128xf32>
    %42 = math.absf %22 : vector<8x128xf32>
    %cst_22 = arith.constant 0.000000e+00 : f32
    %43 = vector.broadcast %cst_22 : f32 to vector<8x128xf32>
    %44 = arith.subf %43, %42 : vector<8x128xf32>
    %45 = math.exp %44 : vector<8x128xf32>
    %46 = math.log1p %45 : vector<8x128xf32>
    %47 = arith.addf %41, %46 : vector<8x128xf32>
    %48 = vector.broadcast %39 : vector<8x1xf32> to vector<8x128xf32>
    %49 = arith.mulf %48, %22 : vector<8x128xf32>
    %cst_23 = arith.constant 9.99999974E-6 : f32
    %50 = vector.broadcast %cst_23 : f32 to vector<8x128xf32>
    %51 = arith.addf %47, %50 : vector<8x128xf32>
    %52 = arith.select %25, %49, %51 : vector<8x128xi1>, vector<8x128xf32>
    %c0_24 = arith.constant 0 : index
    %c0_25 = arith.constant 0 : index
    %53 = vector.load %arg8[%c0_24, %c0_25] : memref<8x128xf32, #tpu.memory_space<vmem>>, vector<8x128xf32>
    tpu.vector_store %arg8[%c0_24, %c0_25], %52 {strides = array<i32>} : memref<8x128xf32, #tpu.memory_space<vmem>>, vector<8x128xf32>,
    return
  }
  func.func @transform_0(%arg0: i32) -> (i32, i32) {
    %c0_i32 = arith.constant 0 : i32
    %c0_i32_0 = arith.constant 0 : i32
    return %arg0, %c0_i32 : i32, i32
  }
  func.func @transform_1(%arg0: i32) -> (i32, i32) {
    %c0_i32 = arith.constant 0 : i32
    %c0_i32_0 = arith.constant 0 : i32
    %c0_i32_1 = arith.constant 0 : i32
    return %c0_i32, %c0_i32_0 : i32, i32
  }
  func.func @transform_2(%arg0: i32) -> (i32, i32) {
    %c0_i32 = arith.constant 0 : i32
    %c0_i32_0 = arith.constant 0 : i32
    %c0_i32_1 = arith.constant 0 : i32
    return %c0_i32, %c0_i32_0 : i32, i32
  }
  func.func @transform_3(%arg0: i32) -> (i32, i32) {
    %c0_i32 = arith.constant 0 : i32
    %c0_i32_0 = arith.constant 0 : i32
    %c0_i32_1 = arith.constant 0 : i32
    return %c0_i32, %c0_i32_0 : i32, i32
  }
  func.func @transform_4(%arg0: i32) -> (i32, i32) {
    %c0_i32 = arith.constant 0 : i32
    %c0_i32_0 = arith.constant 0 : i32
    %c0_i32_1 = arith.constant 0 : i32
    return %c0_i32, %c0_i32_0 : i32, i32
  }
  func.func @transform_5(%arg0: i32) -> (i32, i32) {
    %c0_i32 = arith.constant 0 : i32
    %c0_i32_0 = arith.constant 0 : i32
    %c0_i32_1 = arith.constant 0 : i32
    return %c0_i32, %c0_i32_0 : i32, i32
  }
  func.func @transform_6(%arg0: i32) -> (i32, i32) {
    %c0_i32 = arith.constant 0 : i32
    %c0_i32_0 = arith.constant 0 : i32
    %c0_i32_1 = arith.constant 0 : i32
    return %c0_i32, %c0_i32_0 : i32, i32
  }
  func.func @transform_7(%arg0: i32) -> (i32, i32) {
    %c0_i32 = arith.constant 0 : i32
    %c0_i32_0 = arith.constant 0 : i32
    return %arg0, %c0_i32 : i32, i32
  }
}

</mosaic_0001>

<bundles_post_ra>
// kernel: tpu_custom_call.1
= control target key start
LH: loop header
LB: loop body
LE: loop exit
PB: predicated region body
PF: predicated region fallthrough
CT: control target
= control target key end

     0   :  { %12 = vsyncpa [#allocation3], 0  ;;  %s1782_s0 = inlined_call_operand.hbm [shape: f32[2,1024], index: 0, kind: input, shape index: {}]   ;;  %s1783_s1 = inlined_call_operand.hbm [shape: bf16[1024,128], index: 1, kind: input, shape index: {}]   ;;  %s1784_s2 = inlined_call_operand.vmem [shape: f32[1,128], index: 2, kind: input, shape index: {}]   ;;  %s1785_s3 = inlined_call_operand.hbm [shape: bf16[128,128], index: 3, kind: input, shape index: {}]   ;;  %s1786_s4 = inlined_call_operand.vmem [shape: f32[1,128], index: 4, kind: input, shape index: {}]   ;;  %s1787_s5 = inlined_call_operand.hbm [shape: bf16[128,128], index: 5, kind: input, shape index: {}]   ;;  %s1788_s6 = inlined_call_operand.vmem [shape: f32[1,128], index: 6, kind: input, shape index: {}]   ;;  %s1789_s7 = inlined_call_operand.hbm [shape: f32[2,128], index: 7, kind: output, shape index: {}]  }
   0x1   :  { %13 = vsyncpa [#allocation6], 0 }
   0x2   :  { %14 = vsyncpa [#allocation9], 0 }
   0x3   :  { %15 = vsyncpa [#allocation4], 0 }
   0x4   :  { %20 = vsyncadd [#allocation3], 768  ;;  %s1611_s24 = smov [#allocation5]   ;;  %s1493_s28 = scalar_lea.hbm %s1783_s1, 8192 }
   0x5   :  { %s33_s25 = sshll.u32 %s1611_s24, 4  ;;  %p1494_p0 = scmp.ne.s32.totalorder %s1783_s1, %s1493_s28  ;;  %s34_s25 = int_to_ptr.vmem [resolvable:$true] %s33_s25 }
   0x6   :  { %p1497_p1 = scmp.lt.u32.totalorder %s1493_s28, %s1783_s1 }
   0x8   :  { %p1499_p2 = pnand %p1497_p1, %p1494_p0 }
   0xa   :  { %1502 = shalt.err (!%p1499_p2)
}
   0xb   :  { %s1503_s10 = scalar_lea.vmem %s34_s25, 8192  ;;  %p1508_p4 = scmp.lt.s32.totalorder %s34_s25, %s34_s25 }
   0xc   :  { %p1504_p3 = scmp.ne.s32.totalorder %s34_s25, %s1503_s10  ;;  %p1509_p5 = scmp.lt.s32.totalorder %s1503_s10, %s1503_s10 }
   0xe   :  { %p1510_p6 = por %p1509_p5, %p1508_p4 }
  0x10   :  { %p1511_p7 = pnand %p1510_p6, %p1504_p3 }
  0x12   :  { %1514 = shalt.err (!%p1511_p7)
}
  0x13   :  { %s1612_s11 = smov 64   ;;  %s1613_s12 = smov 4  }
  0x14   :  { %39 = dma.hbm_to_vmem [thread:$0]  %s1783_s1, 8192, %s34_s25, [#allocation6], %s1612_s11, %s1612_s11, %s1613_s12  }
  0x15   :  { %s1614_s15 = smov [#allocation2]   ;;  %s1515_s19 = scalar_lea.hbm %s1782_s0, 256 }
  0x16   :  { %s21_s16 = sshll.u32 %s1614_s15, 4  ;;  %p1516_p8 = scmp.ne.s32.totalorder %s1782_s0, %s1515_s19  ;;  %s22_s16 = int_to_ptr.vmem [resolvable:$true] %s21_s16 }
  0x17   :  { %p1519_p9 = scmp.lt.u32.totalorder %s1515_s19, %s1782_s0 }
  0x19   :  { %p1521_p10 = pnand %p1519_p9, %p1516_p8 }
  0x1b   :  { %1524 = shalt.err (!%p1521_p10)
}
  0x1c   :  { %s1525_s24 = scalar_lea.vmem %s22_s16, 256  ;;  %s1529_s1 = scalar_lea.vmem %s22_s16, 1024 }
  0x1d   :  { %p1526_p11 = scmp.ne.s32.totalorder %s22_s16, %s1525_s24  ;;  %p1530_p12 = scmp.lt.s32.totalorder %s22_s16, %s22_s16 }
  0x1e   :  { %p1531_p13 = scmp.lt.s32.totalorder %s1529_s1, %s1525_s24 }
  0x20   :  { %p1532_p0 = por %p1531_p13, %p1530_p12 }
  0x22   :  { %p1533_p1 = pnand %p1532_p0, %p1526_p11 }
  0x24   :  { %1536 = shalt.err (!%p1533_p1)
}
  0x25   :  { %s1615_s25 = smov 256   ;;  %s1616_s26 = smov 16  }
  0x26   :  { %27 = dma.hbm_to_vmem [thread:$0]  %s1782_s0, 256, %s22_s16, [#allocation3], %s1615_s25, %s1615_s25, %s1616_s26  }
  0x27   :  { %s1617_s29 = smov [#allocation7]   ;;  %s1618_s8 = smov [#allocation8]  }
  0x28   :  { %s47_s30 = sshll.u32 %s1617_s29, 4  ;;  %s61_s9 = sshll.u32 %s1618_s8, 4  ;;  %s48_s30 = int_to_ptr.vmem [resolvable:$true] %s47_s30  ;;  %s1692_s9 = int_to_ptr.vmem [resolvable:$true] %s61_s9 }
  0x29   :  { %s1537_s14 = scalar_lea.hbm %s1785_s3, 1024 }
  0x2a   :  { %p1538_p2 = scmp.ne.s32.totalorder %s1785_s3, %s1537_s14  ;;  %p1541_p3 = scmp.lt.u32.totalorder %s1537_s14, %s1785_s3 }
  0x2c   :  { %p1543_p4 = pnand %p1541_p3, %p1538_p2 }
  0x2e   :  { %1546 = shalt.err (!%p1543_p4)
}
  0x2f   :  { %s1547_s0 = scalar_lea.vmem %s48_s30, 1024  ;;  %p1552_p6 = scmp.lt.s32.totalorder %s48_s30, %s48_s30 }
  0x30   :  { %p1548_p5 = scmp.ne.s32.totalorder %s48_s30, %s1547_s0  ;;  %p1553_p7 = scmp.lt.s32.totalorder %s1547_s0, %s1547_s0 }
  0x32   :  { %p1554_p8 = por %p1553_p7, %p1552_p6 }
  0x34   :  { %p1555_p9 = pnand %p1554_p8, %p1548_p5 }
  0x36   :  { %1558 = shalt.err (!%p1555_p9)
}
  0x37   :  { %53 = dma.hbm_to_vmem [thread:$0]  %s1785_s3, 1024, %s48_s30, [#allocation6], %s1612_s11, %s1612_s11, %s1613_s12  }
  0x38   :  { %s1559_s23 = scalar_lea.hbm %s1787_s5, 1024 }
  0x39   :  { %p1560_p10 = scmp.ne.s32.totalorder %s1787_s5, %s1559_s23  ;;  %p1563_p11 = scmp.lt.u32.totalorder %s1559_s23, %s1787_s5 }
  0x3b   :  { %p1565_p12 = pnand %p1563_p11, %p1560_p10 }
  0x3d   :  { %1568 = shalt.err (!%p1565_p12)
}
  0x3e   :  { %s1569_s27 = scalar_lea.vmem %s1692_s9, 1024  ;;  %p1574_p0 = scmp.lt.s32.totalorder %s1692_s9, %s1692_s9 }
  0x3f   :  { %p1570_p13 = scmp.ne.s32.totalorder %s1692_s9, %s1569_s27  ;;  %p1575_p1 = scmp.lt.s32.totalorder %s1569_s27, %s1569_s27 }
  0x41   :  { %p1576_p2 = por %p1575_p1, %p1574_p0 }
  0x43   :  { %p1577_p3 = pnand %p1576_p2, %p1570_p13 }
  0x45   :  { %1580 = shalt.err (!%p1577_p3)
}
  0x46   :  { %67 = dma.hbm_to_vmem [thread:$0]  %s1787_s5, 1024, %s1692_s9, [#allocation9], %s1612_s11, %s1612_s11, %s1613_s12  }
  0x47   :  { %1603 = dma.done.wait [#allocation3], 1024  }
  0x48   :  { %1604 = vsyncadd [#allocation3], 4294966272 }
  0x49   :  { %1605 = dma.done.wait [#allocation6], 9216  }
  0x4a   :  { %1606 = vsyncadd [#allocation6], 4294958080 }
  0x4b   :  { %1607 = dma.done.wait [#allocation9], 1024  }
  0x4c   :  { %1608 = vsyncadd [#allocation9], 4294966272  ;;  %v1391_v0 = vld [vmem:[#allocation5 + $0x40] sm:$0xff]   ;;  %v1395_v4 = vld [vmem:[#allocation5 + $0x48] sm:$0xff]   ;;  %v1619_v24 = vmov 1983009808   ;;  %v106_v26 = vlaneseq }
  0x4d   :  { %v1392_v1 = vld [vmem:[#allocation5 + $0xc0] sm:$0xff]   ;;  %1231 = vmatprep.subr.bf16.mxu0 %v1391_v0  ;;  %v1396_v5 = vld [vmem:[#allocation5 + $0xc8] sm:$0xff]   ;;  %v1399_v8 = vld [vmem:[#allocation5 + $0x50] sm:$0xff]   ;;  %v104_v25 = vunpack.c.l.s4 %v1619_v24  ;;  %vm1621_vm0 = vmmov 0  }
  0x4e   :  { %v1393_v2 = vld [vmem:[#allocation5] sm:$0xff]   ;;  %1253 = vmatprep.subr.bf16.mxu1 %v1392_v1  ;;  %v1397_v6 = vld [vmem:[#allocation5 + $0x8] sm:$0xff]   ;;  %v1400_v9 = vld [vmem:[#allocation5 + $0xd0] sm:$0xff]   ;;  %v107_v32 = vshrl.u32 %v106_v26, 7 }
  0x4f   :  { %v1394_v3 = vld [vmem:[#allocation5 + $0x80] sm:$0xff]   ;;  %1232 = vmatpush3.bf16.msra.mxu0 %v1393_v2  ;;  %v1398_v7 = vld [vmem:[#allocation5 + $0x88] sm:$0xff]   ;;  %v1401_v10 = vld [vmem:[#allocation5 + $0x10] sm:$0xff]   ;;  %v105_v31 = vunpack.c.0.s8 %v104_v25 }
  0x50   :  { %1254 = vmatpush3.bf16.msra.mxu1 %v1394_v3  ;;  %1233 = vmatprep.subr.bf16.mxu0 %v1395_v4  ;;  %v1402_v11 = vld [vmem:[#allocation5 + $0x90] sm:$0xff]   ;;  %v1403_v12 = vld [vmem:[#allocation5 + $0x58] sm:$0xff]   ;;  %v1407_v16 = vld [vmem:[#allocation5 + $0x60] sm:$0xff]  }
  0x51   :  { %1255 = vmatprep.subr.bf16.mxu1 %v1396_v5  ;;  %v1404_v13 = vld [vmem:[#allocation5 + $0xd8] sm:$0xff]   ;;  %v1408_v17 = vld [vmem:[#allocation5 + $0xe0] sm:$0xff]   ;;  %v1411_v20 = vld [vmem:[#allocation5 + $0x68] sm:$0xff]   ;;  %v1730_v37 = vsub.s32 %v105_v31, %v107_v32 }
  0x52   :  { %v1405_v14 = vld [vmem:[#allocation5 + $0x18] sm:$0xff]   ;;  %v1409_v18 = vld [vmem:[#allocation5 + $0x20] sm:$0xff]   ;;  %v1412_v21 = vld [vmem:[#allocation5 + $0xe8] sm:$0xff]  }
  0x53   :  { %1234 = vmatpush3.bf16.msra.mxu0 %v1397_v6  ;;  %v1406_v15 = vld [vmem:[#allocation5 + $0x98] sm:$0xff]   ;;  %v1410_v19 = vld [vmem:[#allocation5 + $0xa0] sm:$0xff]   ;;  %v1413_v22 = vld [vmem:[#allocation5 + $0x28] sm:$0xff]  }
  0x54   :  { %1256 = vmatpush3.bf16.msra.mxu1 %v1398_v7  ;;  %1235 = vmatprep.subr.bf16.mxu0 %v1399_v8  ;;  %v1414_v23 = vld [vmem:[#allocation5 + $0xa8] sm:$0xff]   ;;  %v1415_v27 = vld [vmem:[#allocation5 + $0x70] sm:$0xff]   ;;  %v1419_v33 = vld [vmem:[#allocation5 + $0x78] sm:$0xff]  }
  0x55   :  { %1257 = vmatprep.subr.bf16.mxu1 %v1400_v9  ;;  %v1416_v28 = vld [vmem:[#allocation5 + $0xf0] sm:$0xff]   ;;  %v1420_v34 = vld [vmem:[#allocation5 + $0xf8] sm:$0xff]   ;;  %v1429_v44 = vld [vmem:[#allocation5 + $0x140] sm:$0xff]  }
  0x56   :  { %v1417_v29 = vld [vmem:[#allocation5 + $0x30] sm:$0xff]   ;;  %v1421_v35 = vld [vmem:[#allocation5 + $0x38] sm:$0xff]   ;;  %v1430_v47 = vld [vmem:[#allocation5 + $0x1c0] sm:$0xff]  }
  0x57   :  { %1236 = vmatpush3.bf16.msra.mxu0 %v1401_v10  ;;  %v1418_v30 = vld [vmem:[#allocation5 + $0xb0] sm:$0xff]   ;;  %v1422_v36 = vld [vmem:[#allocation5 + $0xb8] sm:$0xff]   ;;  %v1431_v50 = vld [vmem:[#allocation5 + $0x100] sm:$0xff]  }
  0x58   :  { %1258 = vmatpush3.bf16.msra.mxu1 %v1402_v11  ;;  %1237 = vmatprep.subr.bf16.mxu0 %v1403_v12  ;;  %v1423_v38 = vld [vmem:[#allocation2] ss:$16 sps:$4 sm:$0xff]   ;;  %v1427_v40 = vld [vmem:[#allocation2 + $0x4] ss:$16 sps:$4 sm:$0xff]   ;;  %v1433_v56 = vld [vmem:[#allocation5 + $0x148] sm:$0xff]  }
  0x59   :  { %1259 = vmatprep.subr.bf16.mxu1 %v1404_v13  ;;  %v1425_v39 = vld [vmem:[#allocation2 + $0x20] ss:$16 sps:$4 sm:$0xff]   ;;  %v1428_v41 = vld [vmem:[#allocation2 + $0x24] ss:$16 sps:$4 sm:$0xff]   ;;  %v109_v42 = vrot.slane %v1423_v38, %v1730_v37  ;;  %v116_v45 = vrot.slane %v1427_v40, %v1730_v37  ;;  %v1434_v59 = vld [vmem:[#allocation5 + $0x1c8] sm:$0xff]  }
  0x5a   :  { %v123_v43 = vrot.slane %v1425_v39, %v1730_v37  ;;  %v130_v46 = vrot.slane %v1428_v41, %v1730_v37  ;;  %v1432_v53 = vld [vmem:[#allocation5 + $0x180] sm:$0xff]   ;;  %v1435_v60 = vld [vmem:[#allocation5 + $0x108] sm:$0xff]   ;;  %v1437_v62 = vld [vmem:[#allocation5 + $0x150] sm:$0xff]   ;;  %v1620_v41 = vmov 0.0  }
  0x5b   :  { %1238 = vmatpush3.bf16.msra.mxu0 %v1405_v14  ;;  %v1436_v61 = vld [vmem:[#allocation5 + $0x188] sm:$0xff]   ;;  %v1438_v63 = vld [vmem:[#allocation5 + $0x1d0] sm:$0xff]   ;;  %v1441_v2 = vld [vmem:[#allocation5 + $0x158] sm:$0xff]  }
  0x5c   :  { %1260 = vmatpush3.bf16.msra.mxu1 %v1406_v15  ;;  %1239 = vmatprep.subr.bf16.mxu0 %v1407_v16  ;;  %v132_v48 = vcombine.high %v109_v42, %v123_v43  ;;  %v131_v49 = vcombine.low %v109_v42, %v123_v43  ;;  %v134_v51 = vcombine.high %v116_v45, %v130_v46  ;;  %v1439_v0 = vld [vmem:[#allocation5 + $0x110] sm:$0xff]   ;;  %v1442_v3 = vld [vmem:[#allocation5 + $0x1d8] sm:$0xff]   ;;  %v1445_v6 = vld [vmem:[#allocation5 + $0x160] sm:$0xff]  }
  0x5d   :  { %1261 = vmatprep.subr.bf16.mxu1 %v1408_v17  ;;  %v133_v52 = vcombine.low %v116_v45, %v130_v46  ;;  %v1440_v1 = vld [vmem:[#allocation5 + $0x190] sm:$0xff]   ;;  %v1443_v4 = vld [vmem:[#allocation5 + $0x118] sm:$0xff]   ;;  %v1446_v7 = vld [vmem:[#allocation5 + $0x1e0] sm:$0xff]  }
  0x5e   :  { %v180_v54 = vpack.c.bf16 %v132_v48, %v132_v48  ;;  %v179_v55 = vpack.c.bf16 %v131_v49, %v131_v49  ;;  %v182_v57 = vpack.c.bf16 %v134_v51, %v134_v51  ;;  %v1444_v5 = vld [vmem:[#allocation5 + $0x198] sm:$0xff]   ;;  %v1447_v8 = vld [vmem:[#allocation5 + $0x120] sm:$0xff]   ;;  %v1449_v10 = vld [vmem:[#allocation5 + $0x168] sm:$0xff]  }
  0x5f   :  { %1240 = vmatpush3.bf16.msra.mxu0 %v1409_v18  ;;  %v181_v58 = vpack.c.bf16 %v133_v52, %v133_v52  ;;  %v1448_v9 = vld [vmem:[#allocation5 + $0x1a0] sm:$0xff]   ;;  %v1450_v11 = vld [vmem:[#allocation5 + $0x1e8] sm:$0xff]   ;;  %v1453_v14 = vld [vmem:[#allocation5 + $0x170] sm:$0xff]  }
  0x60   :  { %1262 = vmatpush3.bf16.msra.mxu1 %v1410_v19  ;;  %1241 = vmatprep.subr.bf16.mxu0 %v1411_v20  ;;  %v1451_v12 = vld [vmem:[#allocation5 + $0x128] sm:$0xff]   ;;  %v1454_v15 = vld [vmem:[#allocation5 + $0x1f0] sm:$0xff]   ;;  %v1457_v18 = vld [vmem:[#allocation5 + $0x178] sm:$0xff]  }
  0x61   :  { %1263 = vmatprep.subr.bf16.mxu1 %v1412_v21  ;;  %738 = vmatprep.mubr.bf16.mxu0 %v180_v54  ;;  %v1452_v13 = vld [vmem:[#allocation5 + $0x1a8] sm:$0xff]   ;;  %v1455_v16 = vld [vmem:[#allocation5 + $0x130] sm:$0xff]   ;;  %v1458_v19 = vld [vmem:[#allocation5 + $0x1f8] sm:$0xff]  }
  0x62   :  { %778 = vmatprep.mubr.bf16.mxu1 %v182_v57  ;;  %v1456_v17 = vld [vmem:[#allocation5 + $0x1b0] sm:$0xff]   ;;  %v1459_v20 = vld [vmem:[#allocation5 + $0x138] sm:$0xff]   ;;  %v1467_v40 = vld [vmem:[#allocation7] sm:$0xff]  }
  0x63   :  { %1242 = vmatpush3.bf16.msra.mxu0 %v1413_v22  ;;  %v1460_v21 = vld [vmem:[#allocation5 + $0x1b8] sm:$0xff]   ;;  %v1469_v42 = vld [vmem:[#allocation7 + $0x10] sm:$0xff]   ;;  %v1472_v45 = vld [vmem:[#allocation7 + $0x28] sm:$0xff]  }
  0x64   :  { %1264 = vmatpush3.bf16.msra.mxu1 %v1414_v23  ;;  %1243 = vmatprep.subr.bf16.mxu0 %v1415_v27  ;;  %v1461_v22 = vld [vmem:[#allocation2 + $0x8] ss:$16 sps:$4 sm:$0xff]   ;;  %v1465_v24 = vld [vmem:[#allocation2 + $0xc] ss:$16 sps:$4 sm:$0xff]   ;;  %v1473_v46 = vld [vmem:[#allocation7 + $0x30] sm:$0xff]  }
  0x65   :  { %1265 = vmatprep.subr.bf16.mxu1 %v1416_v28  ;;  %v1463_v23 = vld [vmem:[#allocation2 + $0x28] ss:$16 sps:$4 sm:$0xff]   ;;  %v1466_v25 = vld [vmem:[#allocation2 + $0x2c] ss:$16 sps:$4 sm:$0xff]   ;;  %v145_v27 = vrot.slane %v1461_v22, %v1730_v37  ;;  %v1475_v48 = vld [vmem:[#allocation8] sm:$0xff]  }
  0x66   :  { %v159_v28 = vrot.slane %v1463_v23, %v1730_v37  ;;  %v1470_v43 = vld [vmem:[#allocation7 + $0x18] sm:$0xff]   ;;  %v1476_v49 = vld [vmem:[#allocation8 + $0x8] sm:$0xff]   ;;  %v1479_v52 = vld [vmem:[#allocation8 + $0x20] sm:$0xff]  }
  0x67   :  { %1244 = vmatpush3.bf16.msra.mxu0 %v1417_v29  ;;  %v152_v29 = vrot.slane %v1465_v24, %v1730_v37  ;;  %v1478_v51 = vld [vmem:[#allocation8 + $0x18] sm:$0xff]  }
  0x68   :  { %1266 = vmatpush3.bf16.msra.mxu1 %v1418_v30  ;;  %1245 = vmatprep.subr.bf16.mxu0 %v1419_v33  ;;  %v166_v30 = vrot.slane %v1466_v25, %v1730_v37  ;;  %v168_v31 = vcombine.high %v145_v27, %v159_v28  ;;  %v167_v32 = vcombine.low %v145_v27, %v159_v28  ;;  %v1468_v37 = vld [vmem:[#allocation7 + $0x8] sm:$0xff]   ;;  %v1093_v28 = vand.u32 127, %v106_v26 }
  0x69   :  { %1267 = vmatprep.subr.bf16.mxu1 %v1420_v34 }
  0x6a   :  { %v170_v33 = vcombine.high %v152_v29, %v166_v30  ;;  %v169_v34 = vcombine.low %v152_v29, %v166_v30  ;;  %v1222_v29 = vld [vmem:[%s1788_s6] ss:$0 sm:$0xff]  ;;  %vm1094_vm1 = vcmp.lt.s32.totalorder %v1093_v28, 6 }
  0x6b   :  { %1246 = vmatpush3.bf16.msra.mxu0 %v1421_v35  ;;  %v184_v35 = vpack.c.bf16 %v168_v31, %v168_v31 }
  0x6c   :  { %1268 = vmatpush3.bf16.msra.mxu1 %v1422_v36  ;;  %1275 = vmatprep.subr.bf16.mxu0 %v1429_v44  ;;  %v183_v36 = vpack.c.bf16 %v167_v32, %v167_v32  ;;  %v186_v38 = vpack.c.bf16 %v170_v33, %v170_v33  ;;  %v185_v39 = vpack.c.bf16 %v169_v34, %v169_v34  ;;  %v1471_v44 = vld [vmem:[#allocation7 + $0x20] sm:$0xff]  }
  0x6d   :  { %1297 = vmatprep.subr.bf16.mxu1 %v1430_v47  ;;  %v1474_v47 = vld [vmem:[#allocation7 + $0x38] sm:$0xff]  }
  0x6e   :  { %739 = vmatmul.mubr.bf16.vlgmr.msra.gmra.mrb[0].mxu0 %v179_v55 }
  0x6f   :  { %779 = vmatmul.mubr.bf16.vlgmr.msra.gmra.mrb[0].mxu1 %v181_v58  ;;  %1276 = vmatpush3.bf16.msra.mxu0 %v1431_v50  ;;  %v1477_v50 = vld [vmem:[#allocation8 + $0x10] sm:$0xff]  }
  0x70   :  { %1298 = vmatpush3.bf16.msra.mxu1 %v1432_v53  ;;  %1277 = vmatprep.subr.bf16.mxu0 %v1433_v56  ;;  %v1480_v53 = vld [vmem:[#allocation8 + $0x28] sm:$0xff]   ;;  %v1148_v56 = vld [vmem:[%s1784_s2] ss:$0 sm:$0xff] }
  0x71   :  { %1299 = vmatprep.subr.bf16.mxu1 %v1434_v59  ;;  %818 = vmatprep.mubr.bf16.mxu0 %v184_v35 }
  0x72   :  { %858 = vmatprep.mubr.bf16.mxu1 %v186_v38 }
  0x73   :  { %1278 = vmatpush3.bf16.msra.mxu0 %v1435_v60 }
  0x74   :  { %1300 = vmatpush3.bf16.msra.mxu1 %v1436_v61  ;;  %1279 = vmatprep.subr.bf16.mxu0 %v1437_v62 }
  0x75   :  { %1301 = vmatprep.subr.bf16.mxu1 %v1438_v63 }
  0x77   :  { %1280 = vmatpush3.bf16.msra.mxu0 %v1439_v0 }
  0x78   :  { %1302 = vmatpush3.bf16.msra.mxu1 %v1440_v1  ;;  %1281 = vmatprep.subr.bf16.mxu0 %v1441_v2 }
  0x79   :  { %1303 = vmatprep.subr.bf16.mxu1 %v1442_v3 }
  0x7b   :  { %1282 = vmatpush3.bf16.msra.mxu0 %v1443_v4 }
  0x7c   :  { %1304 = vmatpush3.bf16.msra.mxu1 %v1444_v5  ;;  %1283 = vmatprep.subr.bf16.mxu0 %v1445_v6 }
  0x7d   :  { %1305 = vmatprep.subr.bf16.mxu1 %v1446_v7 }
  0x7f   :  { %1284 = vmatpush3.bf16.msra.mxu0 %v1447_v8 }
  0x80   :  { %1306 = vmatpush3.bf16.msra.mxu1 %v1448_v9  ;;  %1285 = vmatprep.subr.bf16.mxu0 %v1449_v10 }
  0x81   :  { %1307 = vmatprep.subr.bf16.mxu1 %v1450_v11 }
  0x83   :  { %1286 = vmatpush3.bf16.msra.mxu0 %v1451_v12 }
  0x84   :  { %1308 = vmatpush3.bf16.msra.mxu1 %v1452_v13  ;;  %1287 = vmatprep.subr.bf16.mxu0 %v1453_v14 }
  0x85   :  { %1309 = vmatprep.subr.bf16.mxu1 %v1454_v15 }
  0x87   :  { %1288 = vmatpush3.bf16.msra.mxu0 %v1455_v16 }
  0x88   :  { %1310 = vmatpush3.bf16.msra.mxu1 %v1456_v17  ;;  %1289 = vmatprep.subr.bf16.mxu0 %v1457_v18  ;;  %v1481_v17 = vld [vmem:[#allocation8 + $0x30] sm:$0xff]   ;;  %v1482_v18 = vld [vmem:[#allocation8 + $0x38] sm:$0xff]  }
  0x89   :  { %1311 = vmatprep.subr.bf16.mxu1 %v1458_v19  ;;  %v1213_v19 = vld [vmem:[%s1786_s4] ss:$0 sm:$0xff] }
  0x8b   :  { %1290 = vmatpush3.bf16.msra.mxu0 %v1459_v20 }
  0x8c   :  { %1312 = vmatpush3.bf16.msra.mxu1 %v1460_v21  ;;  %1337 = vmatprep.subr.bf16.mxu0 %v1620_v41 }
  0x8d   :  { %1357 = vmatprep.subr.bf16.mxu1 %v1620_v41 }
  0x8e   :  { %819 = vmatmul.mubr.bf16.vlgmr.msra.gmra.mrb[4].mxu0 %v183_v36 }
  0x8f   :  { %859 = vmatmul.mubr.bf16.vlgmr.msra.gmra.mrb[4].mxu1 %v185_v39  ;;  %1338 = vmatpush3.bf16.msra.mxu0 %v1467_v40 }
  0x90   :  { %1339 = vmatprep.subr.bf16.mxu0 %v1620_v41  ;;  %1353 = vmatprep.mubr.msk.bf16.mxu0 %vm1621_vm0, %v1620_v41 }
  0x91   :  { %1373 = vmatprep.mubr.msk.bf16.mxu1 %vm1621_vm0, %v1620_v41  ;;  %1358 = vmatpush3.bf16.msra.mxu1 %v1475_v48 }
  0x92   :  { %1359 = vmatprep.subr.bf16.mxu1 %v1620_v41 }
  0x93   :  { %1340 = vmatpush3.bf16.msra.mxu0 %v1468_v37 }
  0x94   :  { %1341 = vmatprep.subr.bf16.mxu0 %v1620_v41 }
  0x95   :  { %1360 = vmatpush3.bf16.msra.mxu1 %v1476_v49 }
  0x96   :  { %1361 = vmatprep.subr.bf16.mxu1 %v1620_v41 }
  0x97   :  { %1342 = vmatpush3.bf16.msra.mxu0 %v1469_v42 }
  0x98   :  { %1343 = vmatprep.subr.bf16.mxu0 %v1620_v41 }
  0x99   :  { %1362 = vmatpush3.bf16.msra.mxu1 %v1477_v50 }
  0x9a   :  { %1363 = vmatprep.subr.bf16.mxu1 %v1620_v41 }
  0x9b   :  { %1344 = vmatpush3.bf16.msra.mxu0 %v1470_v43 }
  0x9c   :  { %1345 = vmatprep.subr.bf16.mxu0 %v1620_v41 }
  0x9d   :  { %1364 = vmatpush3.bf16.msra.mxu1 %v1478_v51 }
  0x9e   :  { %1365 = vmatprep.subr.bf16.mxu1 %v1620_v41 }
  0x9f   :  { %1346 = vmatpush3.bf16.msra.mxu0 %v1471_v44 }
  0xa0   :  { %1347 = vmatprep.subr.bf16.mxu0 %v1620_v41 }
  0xa1   :  { %1366 = vmatpush3.bf16.msra.mxu1 %v1479_v52 }
  0xa2   :  { %1367 = vmatprep.subr.bf16.mxu1 %v1620_v41 }
  0xa3   :  { %1348 = vmatpush3.bf16.msra.mxu0 %v1472_v45 }
  0xa4   :  { %1349 = vmatprep.subr.bf16.mxu0 %v1620_v41 }
  0xa5   :  { %1368 = vmatpush3.bf16.msra.mxu1 %v1480_v53 }
  0xa6   :  { %1369 = vmatprep.subr.bf16.mxu1 %v1620_v41 }
  0xa7   :  { %1350 = vmatpush3.bf16.msra.mxu0 %v1473_v46 }
  0xa8   :  { %1351 = vmatprep.subr.bf16.mxu0 %v1620_v41 }
  0xa9   :  { %1370 = vmatpush3.bf16.msra.mxu1 %v1481_v17 }
  0xaa   :  { %1371 = vmatprep.subr.bf16.mxu1 %v1620_v41 }
  0xab   :  { %1352 = vmatpush3.bf16.msra.mxu0 %v1474_v47 }
  0xad   :  { %1372 = vmatpush3.bf16.msra.mxu1 %v1482_v18 }
 0x141   :  { %v1247_v54 = vpop.f32.mrb[0].mxu0 }
 0x142   :  { %v1269_v55 = vpop.f32.mrb[0].mxu1  ;;  %v1248_v57 = vpop.f32.mrb[1].mxu0 }
 0x143   :  { %v1249_v58 = vadd.f32 %v1248_v57, %v1247_v54  ;;  %v1270_v59 = vpop.f32.mrb[1].mxu1  ;;  %v1250_v60 = vpop.f32.mrb[2].mxu0 }
 0x144   :  { %v1271_v61 = vadd.f32 %v1270_v59, %v1269_v55  ;;  %v1272_v62 = vpop.f32.mrb[2].mxu1  ;;  %v1251_v63 = vpop.f32.mrb[3].mxu0 }
 0x145   :  { %v741_v0 = vadd.f32 %v1249_v58, %v1148_v56  ;;  %v1273_v1 = vpop.f32.mrb[3].mxu1 }
 0x147   :  { %v781_v2 = vadd.f32 %v1271_v61, %v741_v0 }
 0x161   :  { %v1291_v3 = vpop.f32.mrb[4].mxu0 }
 0x162   :  { %v1313_v4 = vpop.f32.mrb[4].mxu1  ;;  %v1292_v5 = vpop.f32.mrb[5].mxu0 }
 0x163   :  { %v1293_v6 = vadd.f32 %v1292_v5, %v1291_v3  ;;  %v1314_v7 = vpop.f32.mrb[5].mxu1  ;;  %v1294_v8 = vpop.f32.mrb[6].mxu0 }
 0x164   :  { %v1315_v9 = vadd.f32 %v1314_v7, %v1313_v4  ;;  %v1316_v10 = vpop.f32.mrb[6].mxu1  ;;  %v1295_v11 = vpop.f32.mrb[7].mxu0 }
 0x165   :  { %v821_v12 = vadd.f32 %v1293_v6, %v781_v2  ;;  %v1317_v13 = vpop.f32.mrb[7].mxu1 }
 0x167   :  { %v861_v14 = vadd.f32 %v1315_v9, %v821_v12 }
 0x169   :  { %v866_v15 = vmax.f32 %v861_v14, 0.0 }
 0x16b   :  { %v867_v16 = vpack.c.bf16 %v866_v15, %v866_v15 }
 0x16d   :  { %1354 = vmatmul.mubr.bf16.vlgmr.msra.gmra.mrb[8].mxu0 %v867_v16 }
 0x240   :  { %v973_v20 = vpop.f32.mrb[8].mxu0 }
 0x241   :  { %v974_v21 = vadd.f32 %v1213_v19, %v973_v20  ;;  %v1355_v22 = vpop.f32.mrb[9].mxu0 }
 0x242   :  { %v976_v23 = vpop.f32.mrb[10].mxu0 }
 0x243   :  { %v979_v24 = vmax.f32 %v974_v21, 0.0  ;;  %v1356_v25 = vpop.f32.mrb[11].mxu0 }
 0x245   :  { %v980_v27 = vpack.c.bf16 %v979_v24, %v979_v24 }
 0x247   :  { %1374 = vmatmul.mubr.bf16.vlgmr.msra.gmra.mrb[8].mxu1 %v980_v27 }
 0x31a   :  { %v1086_v30 = vpop.f32.mrb[8].mxu1 }
 0x31b   :  { %v1087_v31 = vadd.f32 %v1222_v29, %v1086_v30  ;;  %v1375_v32 = vpop.f32.mrb[9].mxu1 }
 0x31c   :  { %v1089_v33 = vpop.f32.mrb[10].mxu1 }
 0x31d   :  { %v1376_v34 = vpop.f32.mrb[11].mxu1  ;;  %v1095_v35 = vsel %vm1094_vm1, %v1087_v31, 0.0  ;;  %v1111_v38 = vand.u32 2147483647, %v1087_v31  ;;  %v1110_v55 = vmax.f32 %v1087_v31, 0.0 }
 0x31e   :  { %v1096_v36 = vmul.f32 %v1095_v35, %v1095_v35 }
 0x31f   :  { %v1112_v39 = vsub.f32 0.0, %v1111_v38 }
 0x320   :  { %1097 = vadd.xlane.f32.xlu0 %v1096_v36 }
 0x321   :  { %v1113_v40 = vmul.f32 1.442695, %v1112_v39 }
 0x323   :  { %1483 = vpow2.f32 %v1113_v40 }
 0x32d   :  { %v1484_v26 = vpop.eup %1483 }
 0x32e   :  { %v1115_v37 = vadd.f32 1.0, %v1484_v26  ;;  %v1118_v46 = vmul.f32 -0.5, %v1484_v26  ;;  %v1121_v51 = vand.u32 2147483647, %v1484_v26 }
 0x330   :  { %v1119_v50 = vadd.f32 1.0, %v1118_v46  ;;  %vm1122_vm4 = vcmp.lt.f32.partialorder %v1121_v51, 0.0004427343 }
 0x332   :  { %v1120_v53 = vmul.f32 %v1484_v26, %v1119_v50 }
 0x3ad   :  { %v1098_v41 = vpop.xlane.xlu0 %1097 }
 0x3ae   :  { %1485 = vrsqrt.f32 %v1098_v41  ;;  %vm1101_vm2 = vcmp.eq.f32.partialorder %v1098_v41, inf  ;;  %v1104_v44 = vand.u32 2147483648, %v1098_v41  ;;  %vm1103_vm3 = vcmp.eq.f32.partialorder %v1098_v41, 0.0 }
 0x3af   :  { %1487 = vlog2.f32 %v1115_v37 }
 0x3b8   :  { %v1486_v42 = vpop.eup %1485 }
 0x3b9   :  { %v1100_v43 = vmul.f32 %v1486_v42, %v1098_v41  ;;  %v1488_v49 = vpop.eup %1487 }
 0x3ba   :  { %v1117_v52 = vmul.f32 0.6931472, %v1488_v49 }
 0x3bb   :  { %v1102_v45 = vsel %vm1101_vm2, %v1098_v41, %v1100_v43 }
 0x3bc   :  { %v1105_v47 = vsel %vm1103_vm3, %v1104_v44, %v1102_v45  ;;  %v1123_v54 = vsel %vm1122_vm4, %v1120_v53, %v1117_v52 }
 0x3bd   :  { %v1106_v48 = vmax.f32 %v1105_v47, 1e-15  ;;  %v1124_v57 = vadd.f32 %v1123_v54, %v1110_v55 }
 0x3bf   :  { %1489 = vtanh.f32 %v1106_v48  ;;  %v1126_v60 = vadd.f32 1e-05, %v1124_v57 }
 0x3c0   :  { %1491 = vrcp.f32 %v1106_v48 }
 0x3c9   :  { %v1490_v56 = vpop.eup %1489 }
 0x3ca   :  { %v1492_v58 = vpop.eup %1491 }
 0x3cb   :  { %v1109_v59 = vmul.f32 %v1492_v58, %v1490_v56 }
 0x3cd   :  { %v1125_v61 = vmul.f32 %v1109_v59, %v1087_v31 }
 0x3cf   :  { %v1127_v62 = vsel %vm1094_vm1, %v1125_v61, %v1126_v60 }
 0x3d0   :  { %1128 = vst [vmem:[#allocation10] sm:$0xff] %v1127_v62 }
 0x3d1   :  { %1133 = vsyncadd [#allocation4], 96  ;;  %s1622_s4 = smov [#allocation10]  }
 0x3d2   :  { %s1134_s6 = sshll.u32 %s1622_s4, 4  ;;  %s1135_s6 = int_to_ptr.vmem [resolvable:$true] %s1134_s6 }
 0x3d3   :  { %s1581_s8 = scalar_lea.vmem %s1135_s6, 32  ;;  %s1585_s9 = scalar_lea.vmem %s1135_s6, 128 }
 0x3d4   :  { %p1582_p4 = scmp.ne.s32.totalorder %s1135_s6, %s1581_s8  ;;  %p1586_p5 = scmp.lt.s32.totalorder %s1135_s6, %s1135_s6 }
 0x3d5   :  { %p1587_p6 = scmp.lt.s32.totalorder %s1585_s9, %s1581_s8 }
 0x3d7   :  { %p1588_p7 = por %p1587_p6, %p1586_p5 }
 0x3d9   :  { %p1589_p8 = pnand %p1588_p7, %p1582_p4 }
 0x3db   :  { %1592 = shalt.err (!%p1589_p8)
}
 0x3dc   :  { %s1593_s14 = scalar_lea.hbm %s1789_s7, 32 }
 0x3dd   :  { %p1594_p9 = scmp.ne.s32.totalorder %s1789_s7, %s1593_s14  ;;  %p1597_p10 = scmp.lt.u32.totalorder %s1593_s14, %s1789_s7 }
 0x3df   :  { %p1599_p11 = pnand %p1597_p10, %p1594_p9 }
 0x3e1   :  { %1602 = shalt.err (!%p1599_p11)
}
 0x3e2   :  { %s1623_s0 = smov 32   ;;  %s1624_s16 = smov 2  }
 0x3e3   :  { %1140 = dma.vmem_to_hbm [thread:$0]  %s1135_s6, 32, %s1789_s7, [#allocation4], %s1623_s0, %s1623_s0, %s1624_s16  }
 0x3e4   :  { %1609 = dma.done.wait [#allocation4], 128  }
 0x3e5   :  { %1610 = vsyncadd [#allocation4], 4294967168 }
 0x3e6   :  { %1144 = vsyncpa [#allocation3], 1 }
 0x3e7   :  { %1145 = vsyncpa [#allocation6], 1 }
 0x3e8   :  { %1146 = vsyncpa [#allocation9], 1 }
 0x3e9   :  { %1147 = vsyncpa [#allocation4], 1 }

// kernel: tpu_custom_call.1
= control target key start
LH: loop header
LB: loop body
LE: loop exit
PB: predicated region body
PF: predicated region fallthrough
CT: control target
= control target key end

     0   :  { %12 = vsyncpa [#allocation3], 0  ;;  %s1782_s0 = inlined_call_operand.hbm [shape: f32[2,1024], index: 0, kind: input, shape index: {}]   ;;  %s1783_s1 = inlined_call_operand.hbm [shape: bf16[1024,128], index: 1, kind: input, shape index: {}]   ;;  %s1784_s2 = inlined_call_operand.vmem [shape: f32[1,128], index: 2, kind: input, shape index: {}]   ;;  %s1785_s3 = inlined_call_operand.hbm [shape: bf16[128,128], index: 3, kind: input, shape index: {}]   ;;  %s1786_s4 = inlined_call_operand.vmem [shape: f32[1,128], index: 4, kind: input, shape index: {}]   ;;  %s1787_s5 = inlined_call_operand.hbm [shape: bf16[128,128], index: 5, kind: input, shape index: {}]   ;;  %s1788_s6 = inlined_call_operand.vmem [shape: f32[1,128], index: 6, kind: input, shape index: {}]   ;;  %s1789_s7 = inlined_call_operand.hbm [shape: f32[2,128], index: 7, kind: output, shape index: {}]  }
   0x1   :  { %13 = vsyncpa [#allocation6], 0 }
   0x2   :  { %14 = vsyncpa [#allocation9], 0 }
   0x3   :  { %15 = vsyncpa [#allocation4], 0 }
   0x4   :  { %20 = vsyncadd [#allocation3], 768  ;;  %s1611_s24 = smov [#allocation5]   ;;  %s1493_s28 = scalar_lea.hbm %s1783_s1, 8192 }
   0x5   :  { %s33_s25 = sshll.u32 %s1611_s24, 4  ;;  %p1494_p0 = scmp.ne.s32.totalorder %s1783_s1, %s1493_s28  ;;  %s34_s25 = int_to_ptr.vmem [resolvable:$true] %s33_s25 }
   0x6   :  { %p1497_p1 = scmp.lt.u32.totalorder %s1493_s28, %s1783_s1 }
   0x8   :  { %p1499_p2 = pnand %p1497_p1, %p1494_p0 }
   0xa   :  { %1502 = shalt.err (!%p1499_p2)
}
   0xb   :  { %s1503_s10 = scalar_lea.vmem %s34_s25, 8192  ;;  %p1508_p4 = scmp.lt.s32.totalorder %s34_s25, %s34_s25 }
   0xc   :  { %p1504_p3 = scmp.ne.s32.totalorder %s34_s25, %s1503_s10  ;;  %p1509_p5 = scmp.lt.s32.totalorder %s1503_s10, %s1503_s10 }
   0xe   :  { %p1510_p6 = por %p1509_p5, %p1508_p4 }
  0x10   :  { %p1511_p7 = pnand %p1510_p6, %p1504_p3 }
  0x12   :  { %1514 = shalt.err (!%p1511_p7)
}
  0x13   :  { %s1612_s11 = smov 64   ;;  %s1613_s12 = smov 4  }
  0x14   :  { %39 = dma.hbm_to_vmem [thread:$0]  %s1783_s1, 8192, %s34_s25, [#allocation6], %s1612_s11, %s1612_s11, %s1613_s12  }
  0x15   :  { %s1614_s15 = smov [#allocation2]   ;;  %s1515_s19 = scalar_lea.hbm %s1782_s0, 256 }
  0x16   :  { %s21_s16 = sshll.u32 %s1614_s15, 4  ;;  %p1516_p8 = scmp.ne.s32.totalorder %s1782_s0, %s1515_s19  ;;  %s22_s16 = int_to_ptr.vmem [resolvable:$true] %s21_s16 }
  0x17   :  { %p1519_p9 = scmp.lt.u32.totalorder %s1515_s19, %s1782_s0 }
  0x19   :  { %p1521_p10 = pnand %p1519_p9, %p1516_p8 }
  0x1b   :  { %1524 = shalt.err (!%p1521_p10)
}
  0x1c   :  { %s1525_s24 = scalar_lea.vmem %s22_s16, 256  ;;  %s1529_s1 = scalar_lea.vmem %s22_s16, 1024 }
  0x1d   :  { %p1526_p11 = scmp.ne.s32.totalorder %s22_s16, %s1525_s24  ;;  %p1530_p12 = scmp.lt.s32.totalorder %s22_s16, %s22_s16 }
  0x1e   :  { %p1531_p13 = scmp.lt.s32.totalorder %s1529_s1, %s1525_s24 }
  0x20   :  { %p1532_p0 = por %p1531_p13, %p1530_p12 }
  0x22   :  { %p1533_p1 = pnand %p1532_p0, %p1526_p11 }
  0x24   :  { %1536 = shalt.err (!%p1533_p1)
}
  0x25   :  { %s1615_s25 = smov 256   ;;  %s1616_s26 = smov 16  }
  0x26   :  { %27 = dma.hbm_to_vmem [thread:$0]  %s1782_s0, 256, %s22_s16, [#allocation3], %s1615_s25, %s1615_s25, %s1616_s26  }
  0x27   :  { %s1617_s29 = smov [#allocation7]   ;;  %s1618_s8 = smov [#allocation8]  }
  0x28   :  { %s47_s30 = sshll.u32 %s1617_s29, 4  ;;  %s61_s9 = sshll.u32 %s1618_s8, 4  ;;  %s48_s30 = int_to_ptr.vmem [resolvable:$true] %s47_s30  ;;  %s1692_s9 = int_to_ptr.vmem [resolvable:$true] %s61_s9 }
  0x29   :  { %s1537_s14 = scalar_lea.hbm %s1785_s3, 1024 }
  0x2a   :  { %p1538_p2 = scmp.ne.s32.totalorder %s1785_s3, %s1537_s14  ;;  %p1541_p3 = scmp.lt.u32.totalorder %s1537_s14, %s1785_s3 }
  0x2c   :  { %p1543_p4 = pnand %p1541_p3, %p1538_p2 }
  0x2e   :  { %1546 = shalt.err (!%p1543_p4)
}
  0x2f   :  { %s1547_s0 = scalar_lea.vmem %s48_s30, 1024  ;;  %p1552_p6 = scmp.lt.s32.totalorder %s48_s30, %s48_s30 }
  0x30   :  { %p1548_p5 = scmp.ne.s32.totalorder %s48_s30, %s1547_s0  ;;  %p1553_p7 = scmp.lt.s32.totalorder %s1547_s0, %s1547_s0 }
  0x32   :  { %p1554_p8 = por %p1553_p7, %p1552_p6 }
  0x34   :  { %p1555_p9 = pnand %p1554_p8, %p1548_p5 }
  0x36   :  { %1558 = shalt.err (!%p1555_p9)
}
  0x37   :  { %53 = dma.hbm_to_vmem [thread:$0]  %s1785_s3, 1024, %s48_s30, [#allocation6], %s1612_s11, %s1612_s11, %s1613_s12  }
  0x38   :  { %s1559_s23 = scalar_lea.hbm %s1787_s5, 1024 }
  0x39   :  { %p1560_p10 = scmp.ne.s32.totalorder %s1787_s5, %s1559_s23  ;;  %p1563_p11 = scmp.lt.u32.totalorder %s1559_s23, %s1787_s5 }
  0x3b   :  { %p1565_p12 = pnand %p1563_p11, %p1560_p10 }
  0x3d   :  { %1568 = shalt.err (!%p1565_p12)
}
  0x3e   :  { %s1569_s27 = scalar_lea.vmem %s1692_s9, 1024  ;;  %p1574_p0 = scmp.lt.s32.totalorder %s1692_s9, %s1692_s9 }
  0x3f   :  { %p1570_p13 = scmp.ne.s32.totalorder %s1692_s9, %s1569_s27  ;;  %p1575_p1 = scmp.lt.s32.totalorder %s1569_s27, %s1569_s27 }
  0x41   :  { %p1576_p2 = por %p1575_p1, %p1574_p0 }
  0x43   :  { %p1577_p3 = pnand %p1576_p2, %p1570_p13 }
  0x45   :  { %1580 = shalt.err (!%p1577_p3)
}
  0x46   :  { %67 = dma.hbm_to_vmem [thread:$0]  %s1787_s5, 1024, %s1692_s9, [#allocation9], %s1612_s11, %s1612_s11, %s1613_s12  }
  0x47   :  { %1603 = dma.done.wait [#allocation3], 1024  }
  0x48   :  { %1604 = vsyncadd [#allocation3], 4294966272 }
  0x49   :  { %1605 = dma.done.wait [#allocation6], 9216  }
  0x4a   :  { %1606 = vsyncadd [#allocation6], 4294958080 }
  0x4b   :  { %1607 = dma.done.wait [#allocation9], 1024  }
  0x4c   :  { %1608 = vsyncadd [#allocation9], 4294966272  ;;  %v1391_v0 = vld [vmem:[#allocation5 + $0x40] sm:$0xff]   ;;  %v1395_v4 = vld [vmem:[#allocation5 + $0x48] sm:$0xff]   ;;  %v1619_v24 = vmov 1983009808   ;;  %v106_v26 = vlaneseq }
  0x4d   :  { %v1392_v1 = vld [vmem:[#allocation5 + $0xc0] sm:$0xff]   ;;  %1231 = vmatprep.subr.bf16.mxu0 %v1391_v0  ;;  %v1396_v5 = vld [vmem:[#allocation5 + $0xc8] sm:$0xff]   ;;  %v1399_v8 = vld [vmem:[#allocation5 + $0x50] sm:$0xff]   ;;  %v104_v25 = vunpack.c.l.s4 %v1619_v24  ;;  %vm1621_vm0 = vmmov 0  }
  0x4e   :  { %v1393_v2 = vld [vmem:[#allocation5] sm:$0xff]   ;;  %1253 = vmatprep.subr.bf16.mxu1 %v1392_v1  ;;  %v1397_v6 = vld [vmem:[#allocation5 + $0x8] sm:$0xff]   ;;  %v1400_v9 = vld [vmem:[#allocation5 + $0xd0] sm:$0xff]   ;;  %v107_v32 = vshrl.u32 %v106_v26, 7 }
  0x4f   :  { %v1394_v3 = vld [vmem:[#allocation5 + $0x80] sm:$0xff]   ;;  %1232 = vmatpush3.bf16.msra.mxu0 %v1393_v2  ;;  %v1398_v7 = vld [vmem:[#allocation5 + $0x88] sm:$0xff]   ;;  %v1401_v10 = vld [vmem:[#allocation5 + $0x10] sm:$0xff]   ;;  %v105_v31 = vunpack.c.0.s8 %v104_v25 }
  0x50   :  { %1254 = vmatpush3.bf16.msra.mxu1 %v1394_v3  ;;  %1233 = vmatprep.subr.bf16.mxu0 %v1395_v4  ;;  %v1402_v11 = vld [vmem:[#allocation5 + $0x90] sm:$0xff]   ;;  %v1403_v12 = vld [vmem:[#allocation5 + $0x58] sm:$0xff]   ;;  %v1407_v16 = vld [vmem:[#allocation5 + $0x60] sm:$0xff]  }
  0x51   :  { %1255 = vmatprep.subr.bf16.mxu1 %v1396_v5  ;;  %v1404_v13 = vld [vmem:[#allocation5 + $0xd8] sm:$0xff]   ;;  %v1408_v17 = vld [vmem:[#allocation5 + $0xe0] sm:$0xff]   ;;  %v1411_v20 = vld [vmem:[#allocation5 + $0x68] sm:$0xff]   ;;  %v1730_v37 = vsub.s32 %v105_v31, %v107_v32 }
  0x52   :  { %v1405_v14 = vld [vmem:[#allocation5 + $0x18] sm:$0xff]   ;;  %v1409_v18 = vld [vmem:[#allocation5 + $0x20] sm:$0xff]   ;;  %v1412_v21 = vld [vmem:[#allocation5 + $0xe8] sm:$0xff]  }
  0x53   :  { %1234 = vmatpush3.bf16.msra.mxu0 %v1397_v6  ;;  %v1406_v15 = vld [vmem:[#allocation5 + $0x98] sm:$0xff]   ;;  %v1410_v19 = vld [vmem:[#allocation5 + $0xa0] sm:$0xff]   ;;  %v1413_v22 = vld [vmem:[#allocation5 + $0x28] sm:$0xff]  }
  0x54   :  { %1256 = vmatpush3.bf16.msra.mxu1 %v1398_v7  ;;  %1235 = vmatprep.subr.bf16.mxu0 %v1399_v8  ;;  %v1414_v23 = vld [vmem:[#allocation5 + $0xa8] sm:$0xff]   ;;  %v1415_v27 = vld [vmem:[#allocation5 + $0x70] sm:$0xff]   ;;  %v1419_v33 = vld [vmem:[#allocation5 + $0x78] sm:$0xff]  }
  0x55   :  { %1257 = vmatprep.subr.bf16.mxu1 %v1400_v9  ;;  %v1416_v28 = vld [vmem:[#allocation5 + $0xf0] sm:$0xff]   ;;  %v1420_v34 = vld [vmem:[#allocation5 + $0xf8] sm:$0xff]   ;;  %v1429_v44 = vld [vmem:[#allocation5 + $0x140] sm:$0xff]  }
  0x56   :  { %v1417_v29 = vld [vmem:[#allocation5 + $0x30] sm:$0xff]   ;;  %v1421_v35 = vld [vmem:[#allocation5 + $0x38] sm:$0xff]   ;;  %v1430_v47 = vld [vmem:[#allocation5 + $0x1c0] sm:$0xff]  }
  0x57   :  { %1236 = vmatpush3.bf16.msra.mxu0 %v1401_v10  ;;  %v1418_v30 = vld [vmem:[#allocation5 + $0xb0] sm:$0xff]   ;;  %v1422_v36 = vld [vmem:[#allocation5 + $0xb8] sm:$0xff]   ;;  %v1431_v50 = vld [vmem:[#allocation5 + $0x100] sm:$0xff]  }
  0x58   :  { %1258 = vmatpush3.bf16.msra.mxu1 %v1402_v11  ;;  %1237 = vmatprep.subr.bf16.mxu0 %v1403_v12  ;;  %v1423_v38 = vld [vmem:[#allocation2] ss:$16 sps:$4 sm:$0xff]   ;;  %v1427_v40 = vld [vmem:[#allocation2 + $0x4] ss:$16 sps:$4 sm:$0xff]   ;;  %v1433_v56 = vld [vmem:[#allocation5 + $0x148] sm:$0xff]  }
  0x59   :  { %1259 = vmatprep.subr.bf16.mxu1 %v1404_v13  ;;  %v1425_v39 = vld [vmem:[#allocation2 + $0x20] ss:$16 sps:$4 sm:$0xff]   ;;  %v1428_v41 = vld [vmem:[#allocation2 + $0x24] ss:$16 sps:$4 sm:$0xff]   ;;  %v109_v42 = vrot.slane %v1423_v38, %v1730_v37  ;;  %v116_v45 = vrot.slane %v1427_v40, %v1730_v37  ;;  %v1434_v59 = vld [vmem:[#allocation5 + $0x1c8] sm:$0xff]  }
  0x5a   :  { %v123_v43 = vrot.slane %v1425_v39, %v1730_v37  ;;  %v130_v46 = vrot.slane %v1428_v41, %v1730_v37  ;;  %v1432_v53 = vld [vmem:[#allocation5 + $0x180] sm:$0xff]   ;;  %v1435_v60 = vld [vmem:[#allocation5 + $0x108] sm:$0xff]   ;;  %v1437_v62 = vld [vmem:[#allocation5 + $0x150] sm:$0xff]   ;;  %v1620_v41 = vmov 0.0  }
  0x5b   :  { %1238 = vmatpush3.bf16.msra.mxu0 %v1405_v14  ;;  %v1436_v61 = vld [vmem:[#allocation5 + $0x188] sm:$0xff]   ;;  %v1438_v63 = vld [vmem:[#allocation5 + $0x1d0] sm:$0xff]   ;;  %v1441_v2 = vld [vmem:[#allocation5 + $0x158] sm:$0xff]  }
  0x5c   :  { %1260 = vmatpush3.bf16.msra.mxu1 %v1406_v15  ;;  %1239 = vmatprep.subr.bf16.mxu0 %v1407_v16  ;;  %v132_v48 = vcombine.high %v109_v42, %v123_v43  ;;  %v131_v49 = vcombine.low %v109_v42, %v123_v43  ;;  %v134_v51 = vcombine.high %v116_v45, %v130_v46  ;;  %v1439_v0 = vld [vmem:[#allocation5 + $0x110] sm:$0xff]   ;;  %v1442_v3 = vld [vmem:[#allocation5 + $0x1d8] sm:$0xff]   ;;  %v1445_v6 = vld [vmem:[#allocation5 + $0x160] sm:$0xff]  }
  0x5d   :  { %1261 = vmatprep.subr.bf16.mxu1 %v1408_v17  ;;  %v133_v52 = vcombine.low %v116_v45, %v130_v46  ;;  %v1440_v1 = vld [vmem:[#allocation5 + $0x190] sm:$0xff]   ;;  %v1443_v4 = vld [vmem:[#allocation5 + $0x118] sm:$0xff]   ;;  %v1446_v7 = vld [vmem:[#allocation5 + $0x1e0] sm:$0xff]  }
  0x5e   :  { %v180_v54 = vpack.c.bf16 %v132_v48, %v132_v48  ;;  %v179_v55 = vpack.c.bf16 %v131_v49, %v131_v49  ;;  %v182_v57 = vpack.c.bf16 %v134_v51, %v134_v51  ;;  %v1444_v5 = vld [vmem:[#allocation5 + $0x198] sm:$0xff]   ;;  %v1447_v8 = vld [vmem:[#allocation5 + $0x120] sm:$0xff]   ;;  %v1449_v10 = vld [vmem:[#allocation5 + $0x168] sm:$0xff]  }
  0x5f   :  { %1240 = vmatpush3.bf16.msra.mxu0 %v1409_v18  ;;  %v181_v58 = vpack.c.bf16 %v133_v52, %v133_v52  ;;  %v1448_v9 = vld [vmem:[#allocation5 + $0x1a0] sm:$0xff]   ;;  %v1450_v11 = vld [vmem:[#allocation5 + $0x1e8] sm:$0xff]   ;;  %v1453_v14 = vld [vmem:[#allocation5 + $0x170] sm:$0xff]  }
  0x60   :  { %1262 = vmatpush3.bf16.msra.mxu1 %v1410_v19  ;;  %1241 = vmatprep.subr.bf16.mxu0 %v1411_v20  ;;  %v1451_v12 = vld [vmem:[#allocation5 + $0x128] sm:$0xff]   ;;  %v1454_v15 = vld [vmem:[#allocation5 + $0x1f0] sm:$0xff]   ;;  %v1457_v18 = vld [vmem:[#allocation5 + $0x178] sm:$0xff]  }
  0x61   :  { %1263 = vmatprep.subr.bf16.mxu1 %v1412_v21  ;;  %738 = vmatprep.mubr.bf16.mxu0 %v180_v54  ;;  %v1452_v13 = vld [vmem:[#allocation5 + $0x1a8] sm:$0xff]   ;;  %v1455_v16 = vld [vmem:[#allocation5 + $0x130] sm:$0xff]   ;;  %v1458_v19 = vld [vmem:[#allocation5 + $0x1f8] sm:$0xff]  }
  0x62   :  { %778 = vmatprep.mubr.bf16.mxu1 %v182_v57  ;;  %v1456_v17 = vld [vmem:[#allocation5 + $0x1b0] sm:$0xff]   ;;  %v1459_v20 = vld [vmem:[#allocation5 + $0x138] sm:$0xff]   ;;  %v1467_v40 = vld [vmem:[#allocation7] sm:$0xff]  }
  0x63   :  { %1242 = vmatpush3.bf16.msra.mxu0 %v1413_v22  ;;  %v1460_v21 = vld [vmem:[#allocation5 + $0x1b8] sm:$0xff]   ;;  %v1469_v42 = vld [vmem:[#allocation7 + $0x10] sm:$0xff]   ;;  %v1472_v45 = vld [vmem:[#allocation7 + $0x28] sm:$0xff]  }
  0x64   :  { %1264 = vmatpush3.bf16.msra.mxu1 %v1414_v23  ;;  %1243 = vmatprep.subr.bf16.mxu0 %v1415_v27  ;;  %v1461_v22 = vld [vmem:[#allocation2 + $0x8] ss:$16 sps:$4 sm:$0xff]   ;;  %v1465_v24 = vld [vmem:[#allocation2 + $0xc] ss:$16 sps:$4 sm:$0xff]   ;;  %v1473_v46 = vld [vmem:[#allocation7 + $0x30] sm:$0xff]  }
  0x65   :  { %1265 = vmatprep.subr.bf16.mxu1 %v1416_v28  ;;  %v1463_v23 = vld [vmem:[#allocation2 + $0x28] ss:$16 sps:$4 sm:$0xff]   ;;  %v1466_v25 = vld [vmem:[#allocation2 + $0x2c] ss:$16 sps:$4 sm:$0xff]   ;;  %v145_v27 = vrot.slane %v1461_v22, %v1730_v37  ;;  %v1475_v48 = vld [vmem:[#allocation8] sm:$0xff]  }
  0x66   :  { %v159_v28 = vrot.slane %v1463_v23, %v1730_v37  ;;  %v1470_v43 = vld [vmem:[#allocation7 + $0x18] sm:$0xff]   ;;  %v1476_v49 = vld [vmem:[#allocation8 + $0x8] sm:$0xff]   ;;  %v1479_v52 = vld [vmem:[#allocation8 + $0x20] sm:$0xff]  }
  0x67   :  { %1244 = vmatpush3.bf16.msra.mxu0 %v1417_v29  ;;  %v152_v29 = vrot.slane %v1465_v24, %v1730_v37  ;;  %v1478_v51 = vld [vmem:[#allocation8 + $0x18] sm:$0xff]  }
  0x68   :  { %1266 = vmatpush3.bf16.msra.mxu1 %v1418_v30  ;;  %1245 = vmatprep.subr.bf16.mxu0 %v1419_v33  ;;  %v166_v30 = vrot.slane %v1466_v25, %v1730_v37  ;;  %v168_v31 = vcombine.high %v145_v27, %v159_v28  ;;  %v167_v32 = vcombine.low %v145_v27, %v159_v28  ;;  %v1468_v37 = vld [vmem:[#allocation7 + $0x8] sm:$0xff]   ;;  %v1093_v28 = vand.u32 127, %v106_v26 }
  0x69   :  { %1267 = vmatprep.subr.bf16.mxu1 %v1420_v34 }
  0x6a   :  { %v170_v33 = vcombine.high %v152_v29, %v166_v30  ;;  %v169_v34 = vcombine.low %v152_v29, %v166_v30  ;;  %v1222_v29 = vld [vmem:[%s1788_s6] ss:$0 sm:$0xff]  ;;  %vm1094_vm1 = vcmp.lt.s32.totalorder %v1093_v28, 6 }
  0x6b   :  { %1246 = vmatpush3.bf16.msra.mxu0 %v1421_v35  ;;  %v184_v35 = vpack.c.bf16 %v168_v31, %v168_v31 }
  0x6c   :  { %1268 = vmatpush3.bf16.msra.mxu1 %v1422_v36  ;;  %1275 = vmatprep.subr.bf16.mxu0 %v1429_v44  ;;  %v183_v36 = vpack.c.bf16 %v167_v32, %v167_v32  ;;  %v186_v38 = vpack.c.bf16 %v170_v33, %v170_v33  ;;  %v185_v39 = vpack.c.bf16 %v169_v34, %v169_v34  ;;  %v1471_v44 = vld [vmem:[#allocation7 + $0x20] sm:$0xff]  }
  0x6d   :  { %1297 = vmatprep.subr.bf16.mxu1 %v1430_v47  ;;  %v1474_v47 = vld [vmem:[#allocation7 + $0x38] sm:$0xff]  }
  0x6e   :  { %739 = vmatmul.mubr.bf16.vlgmr.msra.gmra.mrb[0].mxu0 %v179_v55 }
  0x6f   :  { %779 = vmatmul.mubr.bf16.vlgmr.msra.gmra.mrb[0].mxu1 %v181_v58  ;;  %1276 = vmatpush3.bf16.msra.mxu0 %v1431_v50  ;;  %v1477_v50 = vld [vmem:[#allocation8 + $0x10] sm:$0xff]  }
  0x70   :  { %1298 = vmatpush3.bf16.msra.mxu1 %v1432_v53  ;;  %1277 = vmatprep.subr.bf16.mxu0 %v1433_v56  ;;  %v1480_v53 = vld [vmem:[#allocation8 + $0x28] sm:$0xff]   ;;  %v1148_v56 = vld [vmem:[%s1784_s2] ss:$0 sm:$0xff] }
  0x71   :  { %1299 = vmatprep.subr.bf16.mxu1 %v1434_v59  ;;  %818 = vmatprep.mubr.bf16.mxu0 %v184_v35 }
  0x72   :  { %858 = vmatprep.mubr.bf16.mxu1 %v186_v38 }
  0x73   :  { %1278 = vmatpush3.bf16.msra.mxu0 %v1435_v60 }
  0x74   :  { %1300 = vmatpush3.bf16.msra.mxu1 %v1436_v61  ;;  %1279 = vmatprep.subr.bf16.mxu0 %v1437_v62 }
  0x75   :  { %1301 = vmatprep.subr.bf16.mxu1 %v1438_v63 }
  0x77   :  { %1280 = vmatpush3.bf16.msra.mxu0 %v1439_v0 }
  0x78   :  { %1302 = vmatpush3.bf16.msra.mxu1 %v1440_v1  ;;  %1281 = vmatprep.subr.bf16.mxu0 %v1441_v2 }
  0x79   :  { %1303 = vmatprep.subr.bf16.mxu1 %v1442_v3 }
  0x7b   :  { %1282 = vmatpush3.bf16.msra.mxu0 %v1443_v4 }
  0x7c   :  { %1304 = vmatpush3.bf16.msra.mxu1 %v1444_v5  ;;  %1283 = vmatprep.subr.bf16.mxu0 %v1445_v6 }
  0x7d   :  { %1305 = vmatprep.subr.bf16.mxu1 %v1446_v7 }
  0x7f   :  { %1284 = vmatpush3.bf16.msra.mxu0 %v1447_v8 }
  0x80   :  { %1306 = vmatpush3.bf16.msra.mxu1 %v1448_v9  ;;  %1285 = vmatprep.subr.bf16.mxu0 %v1449_v10 }
  0x81   :  { %1307 = vmatprep.subr.bf16.mxu1 %v1450_v11 }
  0x83   :  { %1286 = vmatpush3.bf16.msra.mxu0 %v1451_v12 }
  0x84   :  { %1308 = vmatpush3.bf16.msra.mxu1 %v1452_v13  ;;  %1287 = vmatprep.subr.bf16.mxu0 %v1453_v14 }
  0x85   :  { %1309 = vmatprep.subr.bf16.mxu1 %v1454_v15 }
  0x87   :  { %1288 = vmatpush3.bf16.msra.mxu0 %v1455_v16 }
  0x88   :  { %1310 = vmatpush3.bf16.msra.mxu1 %v1456_v17  ;;  %1289 = vmatprep.subr.bf16.mxu0 %v1457_v18  ;;  %v1481_v17 = vld [vmem:[#allocation8 + $0x30] sm:$0xff]   ;;  %v1482_v18 = vld [vmem:[#allocation8 + $0x38] sm:$0xff]  }
  0x89   :  { %1311 = vmatprep.subr.bf16.mxu1 %v1458_v19  ;;  %v1213_v19 = vld [vmem:[%s1786_s4] ss:$0 sm:$0xff] }
  0x8b   :  { %1290 = vmatpush3.bf16.msra.mxu0 %v1459_v20 }
  0x8c   :  { %1312 = vmatpush3.bf16.msra.mxu1 %v1460_v21  ;;  %1337 = vmatprep.subr.bf16.mxu0 %v1620_v41 }
  0x8d   :  { %1357 = vmatprep.subr.bf16.mxu1 %v1620_v41 }
  0x8e   :  { %819 = vmatmul.mubr.bf16.vlgmr.msra.gmra.mrb[4].mxu0 %v183_v36 }
  0x8f   :  { %859 = vmatmul.mubr.bf16.vlgmr.msra.gmra.mrb[4].mxu1 %v185_v39  ;;  %1338 = vmatpush3.bf16.msra.mxu0 %v1467_v40 }
  0x90   :  { %1339 = vmatprep.subr.bf16.mxu0 %v1620_v41  ;;  %1353 = vmatprep.mubr.msk.bf16.mxu0 %vm1621_vm0, %v1620_v41 }
  0x91   :  { %1373 = vmatprep.mubr.msk.bf16.mxu1 %vm1621_vm0, %v1620_v41  ;;  %1358 = vmatpush3.bf16.msra.mxu1 %v1475_v48 }
  0x92   :  { %1359 = vmatprep.subr.bf16.mxu1 %v1620_v41 }
  0x93   :  { %1340 = vmatpush3.bf16.msra.mxu0 %v1468_v37 }
  0x94   :  { %1341 = vmatprep.subr.bf16.mxu0 %v1620_v41 }
  0x95   :  { %1360 = vmatpush3.bf16.msra.mxu1 %v1476_v49 }
  0x96   :  { %1361 = vmatprep.subr.bf16.mxu1 %v1620_v41 }
  0x97   :  { %1342 = vmatpush3.bf16.msra.mxu0 %v1469_v42 }
  0x98   :  { %1343 = vmatprep.subr.bf16.mxu0 %v1620_v41 }
  0x99   :  { %1362 = vmatpush3.bf16.msra.mxu1 %v1477_v50 }
  0x9a   :  { %1363 = vmatprep.subr.bf16.mxu1 %v1620_v41 }
  0x9b   :  { %1344 = vmatpush3.bf16.msra.mxu0 %v1470_v43 }
  0x9c   :  { %1345 = vmatprep.subr.bf16.mxu0 %v1620_v41 }
  0x9d   :  { %1364 = vmatpush3.bf16.msra.mxu1 %v1478_v51 }
  0x9e   :  { %1365 = vmatprep.subr.bf16.mxu1 %v1620_v41 }
  0x9f   :  { %1346 = vmatpush3.bf16.msra.mxu0 %v1471_v44 }
  0xa0   :  { %1347 = vmatprep.subr.bf16.mxu0 %v1620_v41 }
  0xa1   :  { %1366 = vmatpush3.bf16.msra.mxu1 %v1479_v52 }
  0xa2   :  { %1367 = vmatprep.subr.bf16.mxu1 %v1620_v41 }
  0xa3   :  { %1348 = vmatpush3.bf16.msra.mxu0 %v1472_v45 }
  0xa4   :  { %1349 = vmatprep.subr.bf16.mxu0 %v1620_v41 }
  0xa5   :  { %1368 = vmatpush3.bf16.msra.mxu1 %v1480_v53 }
  0xa6   :  { %1369 = vmatprep.subr.bf16.mxu1 %v1620_v41 }
  0xa7   :  { %1350 = vmatpush3.bf16.msra.mxu0 %v1473_v46 }
  0xa8   :  { %1351 = vmatprep.subr.bf16.mxu0 %v1620_v41 }
  0xa9   :  { %1370 = vmatpush3.bf16.msra.mxu1 %v1481_v17 }
  0xaa   :  { %1371 = vmatprep.subr.bf16.mxu1 %v1620_v41 }
  0xab   :  { %1352 = vmatpush3.bf16.msra.mxu0 %v1474_v47 }
  0xad   :  { %1372 = vmatpush3.bf16.msra.mxu1 %v1482_v18 }
 0x141   :  { %v1247_v54 = vpop.f32.mrb[0].mxu0 }
 0x142   :  { %v1269_v55 = vpop.f32.mrb[0].mxu1  ;;  %v1248_v57 = vpop.f32.mrb[1].mxu0 }
 0x143   :  { %v1249_v58 = vadd.f32 %v1248_v57, %v1247_v54  ;;  %v1270_v59 = vpop.f32.mrb[1].mxu1  ;;  %v1250_v60 = vpop.f32.mrb[2].mxu0 }
 0x144   :  { %v1271_v61 = vadd.f32 %v1270_v59, %v1269_v55  ;;  %v1272_v62 = vpop.f32.mrb[2].mxu1  ;;  %v1251_v63 = vpop.f32.mrb[3].mxu0 }
 0x145   :  { %v741_v0 = vadd.f32 %v1249_v58, %v1148_v56  ;;  %v1273_v1 = vpop.f32.mrb[3].mxu1 }
 0x147   :  { %v781_v2 = vadd.f32 %v1271_v61, %v741_v0 }
 0x161   :  { %v1291_v3 = vpop.f32.mrb[4].mxu0 }
 0x162   :  { %v1313_v4 = vpop.f32.mrb[4].mxu1  ;;  %v1292_v5 = vpop.f32.mrb[5].mxu0 }
 0x163   :  { %v1293_v6 = vadd.f32 %v1292_v5, %v1291_v3  ;;  %v1314_v7 = vpop.f32.mrb[5].mxu1  ;;  %v1294_v8 = vpop.f32.mrb[6].mxu0 }
 0x164   :  { %v1315_v9 = vadd.f32 %v1314_v7, %v1313_v4  ;;  %v1316_v10 = vpop.f32.mrb[6].mxu1  ;;  %v1295_v11 = vpop.f32.mrb[7].mxu0 }
 0x165   :  { %v821_v12 = vadd.f32 %v1293_v6, %v781_v2  ;;  %v1317_v13 = vpop.f32.mrb[7].mxu1 }
 0x167   :  { %v861_v14 = vadd.f32 %v1315_v9, %v821_v12 }
 0x169   :  { %v866_v15 = vmax.f32 %v861_v14, 0.0 }
 0x16b   :  { %v867_v16 = vpack.c.bf16 %v866_v15, %v866_v15 }
 0x16d   :  { %1354 = vmatmul.mubr.bf16.vlgmr.msra.gmra.mrb[8].mxu0 %v867_v16 }
 0x240   :  { %v973_v20 = vpop.f32.mrb[8].mxu0 }
 0x241   :  { %v974_v21 = vadd.f32 %v1213_v19, %v973_v20  ;;  %v1355_v22 = vpop.f32.mrb[9].mxu0 }
 0x242   :  { %v976_v23 = vpop.f32.mrb[10].mxu0 }
 0x243   :  { %v979_v24 = vmax.f32 %v974_v21, 0.0  ;;  %v1356_v25 = vpop.f32.mrb[11].mxu0 }
 0x245   :  { %v980_v27 = vpack.c.bf16 %v979_v24, %v979_v24 }
 0x247   :  { %1374 = vmatmul.mubr.bf16.vlgmr.msra.gmra.mrb[8].mxu1 %v980_v27 }
 0x31a   :  { %v1086_v30 = vpop.f32.mrb[8].mxu1 }
 0x31b   :  { %v1087_v31 = vadd.f32 %v1222_v29, %v1086_v30  ;;  %v1375_v32 = vpop.f32.mrb[9].mxu1 }
 0x31c   :  { %v1089_v33 = vpop.f32.mrb[10].mxu1 }
 0x31d   :  { %v1376_v34 = vpop.f32.mrb[11].mxu1  ;;  %v1095_v35 = vsel %vm1094_vm1, %v1087_v31, 0.0  ;;  %v1111_v38 = vand.u32 2147483647, %v1087_v31  ;;  %v1110_v55 = vmax.f32 %v1087_v31, 0.0 }
 0x31e   :  { %v1096_v36 = vmul.f32 %v1095_v35, %v1095_v35 }
 0x31f   :  { %v1112_v39 = vsub.f32 0.0, %v1111_v38 }
 0x320   :  { %1097 = vadd.xlane.f32.xlu0 %v1096_v36 }
 0x321   :  { %v1113_v40 = vmul.f32 1.442695, %v1112_v39 }
 0x323   :  { %1483 = vpow2.f32 %v1113_v40 }
 0x32d   :  { %v1484_v26 = vpop.eup %1483 }
 0x32e   :  { %v1115_v37 = vadd.f32 1.0, %v1484_v26  ;;  %v1118_v46 = vmul.f32 -0.5, %v1484_v26  ;;  %v1121_v51 = vand.u32 2147483647, %v1484_v26 }
 0x330   :  { %v1119_v50 = vadd.f32 1.0, %v1118_v46  ;;  %vm1122_vm4 = vcmp.lt.f32.partialorder %v1121_v51, 0.0004427343 }
 0x332   :  { %v1120_v53 = vmul.f32 %v1484_v26, %v1119_v50 }
 0x3ad   :  { %v1098_v41 = vpop.xlane.xlu0 %1097 }
 0x3ae   :  { %1485 = vrsqrt.f32 %v1098_v41  ;;  %vm1101_vm2 = vcmp.eq.f32.partialorder %v1098_v41, inf  ;;  %v1104_v44 = vand.u32 2147483648, %v1098_v41  ;;  %vm1103_vm3 = vcmp.eq.f32.partialorder %v1098_v41, 0.0 }
 0x3af   :  { %1487 = vlog2.f32 %v1115_v37 }
 0x3b8   :  { %v1486_v42 = vpop.eup %1485 }
 0x3b9   :  { %v1100_v43 = vmul.f32 %v1486_v42, %v1098_v41  ;;  %v1488_v49 = vpop.eup %1487 }
 0x3ba   :  { %v1117_v52 = vmul.f32 0.6931472, %v1488_v49 }
 0x3bb   :  { %v1102_v45 = vsel %vm1101_vm2, %v1098_v41, %v1100_v43 }
 0x3bc   :  { %v1105_v47 = vsel %vm1103_vm3, %v1104_v44, %v1102_v45  ;;  %v1123_v54 = vsel %vm1122_vm4, %v1120_v53, %v1117_v52 }
 0x3bd   :  { %v1106_v48 = vmax.f32 %v1105_v47, 1e-15  ;;  %v1124_v57 = vadd.f32 %v1123_v54, %v1110_v55 }
 0x3bf   :  { %1489 = vtanh.f32 %v1106_v48  ;;  %v1126_v60 = vadd.f32 1e-05, %v1124_v57 }
 0x3c0   :  { %1491 = vrcp.f32 %v1106_v48 }
 0x3c9   :  { %v1490_v56 = vpop.eup %1489 }
 0x3ca   :  { %v1492_v58 = vpop.eup %1491 }
 0x3cb   :  { %v1109_v59 = vmul.f32 %v1492_v58, %v1490_v56 }
 0x3cd   :  { %v1125_v61 = vmul.f32 %v1109_v59, %v1087_v31 }
 0x3cf   :  { %v1127_v62 = vsel %vm1094_vm1, %v1125_v61, %v1126_v60 }
 0x3d0   :  { %1128 = vst [vmem:[#allocation10] sm:$0xff] %v1127_v62 }
 0x3d1   :  { %1133 = vsyncadd [#allocation4], 96  ;;  %s1622_s4 = smov [#allocation10]  }
 0x3d2   :  { %s1134_s6 = sshll.u32 %s1622_s4, 4  ;;  %s1135_s6 = int_to_ptr.vmem [resolvable:$true] %s1134_s6 }
 0x3d3   :  { %s1581_s8 = scalar_lea.vmem %s1135_s6, 32  ;;  %s1585_s9 = scalar_lea.vmem %s1135_s6, 128 }
 0x3d4   :  { %p1582_p4 = scmp.ne.s32.totalorder %s1135_s6, %s1581_s8  ;;  %p1586_p5 = scmp.lt.s32.totalorder %s1135_s6, %s1135_s6 }
 0x3d5   :  { %p1587_p6 = scmp.lt.s32.totalorder %s1585_s9, %s1581_s8 }
 0x3d7   :  { %p1588_p7 = por %p1587_p6, %p1586_p5 }
 0x3d9   :  { %p1589_p8 = pnand %p1588_p7, %p1582_p4 }
 0x3db   :  { %1592 = shalt.err (!%p1589_p8)
}
 0x3dc   :  { %s1593_s14 = scalar_lea.hbm %s1789_s7, 32 }
 0x3dd   :  { %p1594_p9 = scmp.ne.s32.totalorder %s1789_s7, %s1593_s14  ;;  %p1597_p10 = scmp.lt.u32.totalorder %s1593_s14, %s1789_s7 }
 0x3df   :  { %p1599_p11 = pnand %p1597_p10, %p1594_p9 }
 0x3e1   :  { %1602 = shalt.err (!%p1599_p11)
}
 0x3e2   :  { %s1623_s0 = smov 32   ;;  %s1624_s16 = smov 2  }
 0x3e3   :  { %1140 = dma.vmem_to_hbm [thread:$0]  %s1135_s6, 32, %s1789_s7, [#allocation4], %s1623_s0, %s1623_s0, %s1624_s16  }
 0x3e4   :  { %1609 = dma.done.wait [#allocation4], 128  }
 0x3e5   :  { %1610 = vsyncadd [#allocation4], 4294967168 }
 0x3e6   :  { %1144 = vsyncpa [#allocation3], 1 }
 0x3e7   :  { %1145 = vsyncpa [#allocation6], 1 }
 0x3e8   :  { %1146 = vsyncpa [#allocation9], 1 }
 0x3e9   :  { %1147 = vsyncpa [#allocation4], 1 }

</bundles_post_ra>
